<compile_context>
chip_gen: v7x
topology: tpu7x:2x2x1
jax: 0.10.0
libtpu: 0.0.40
codegen_flags: <defaults>
</compile_context>

<pallas_src>
import jax
import jax.numpy as jnp
from jax.experimental import pallas as pl
from jax.experimental.pallas import tpu as pltpu


def _triplet_mlp_kernel(x1_ref, x2_ref, x3_ref, w1_ref, b1_ref, w2_ref, b2_ref,
                        o1_ref, o2_ref, o3_ref):
    # x*_ref : (TM, D)      f32   one row-tile of a flattened branch input
    # w1_ref : (D, H)       f32   shared layer-1 weight (cast to bf16 in-kernel)
    # b1_ref : (1, H)       f32   shared layer-1 bias
    # w2_ref : (H, E_pad)   f32   shared layer-2 weight, lane-padded
    # b2_ref : (1, E_pad)   f32   shared layer-2 bias,   lane-padded
    # o*_ref : (TM, E_pad)  bf16  lane-dense output tile per branch
    w1 = w1_ref[...].astype(jnp.bfloat16)
    b1 = b1_ref[...]                       # f32
    w2 = w2_ref[...].astype(jnp.bfloat16)
    b2 = b2_ref[...]                       # f32

    for x_ref, o_ref in ((x1_ref, o1_ref), (x2_ref, o2_ref), (x3_ref, o3_ref)):
        x = x_ref[...].astype(jnp.bfloat16)                                # in-kernel downcast
        h = jnp.dot(x, w1, preferred_element_type=jnp.float32)             # MXU, f32 acc
        h = jnp.maximum(h + b1, 0.0)                                       # bias+ReLU in f32
        out = jnp.dot(h.astype(jnp.bfloat16), w2,
                      preferred_element_type=jnp.float32)                  # MXU, f32 acc
        o_ref[...] = (out + b2).astype(o_ref.dtype)                        # bf16 store


def triplet_net_forward(x1, x2, x3, params):
    """Pallas implementation of TripletNet.forward with a shared MLP embedding net."""
    w1, b1, w2, b2 = params
    B = x1.shape[0]
    D, H = w1.shape
    E = w2.shape[1]
    E_pad = pl.cdiv(E, 128) * 128          # lane-dense output width

    # Free reshapes only — no concat / cast / pad of activations on the wrapper side.
    xf1 = x1.reshape(B, -1)
    xf2 = x2.reshape(B, -1)
    xf3 = x3.reshape(B, -1)

    # Tiny one-time pads so layer-2 output columns are a full 128-lane tile.
    w2_p = jnp.pad(w2, ((0, 0), (0, E_pad - E)))
    b2_p = jnp.pad(b2, ((0, 0), (0, E_pad - E)))

    # Batch tiling: one full-array block at small B; 256-row tiles (MXU row dim
    # on v6e/v7x) once the batch is large enough to pipeline / dual-core shard.
    TM = B if B <= 256 else 256
    grid_m = pl.cdiv(B, TM)

    x_spec = pl.BlockSpec((TM, D), lambda i: (i, 0))
    o_spec = pl.BlockSpec((TM, E_pad), lambda i: (i, 0))
    w1_spec = pl.BlockSpec((D, H), lambda i: (0, 0))       # constant -> no re-copy
    b1_spec = pl.BlockSpec((1, H), lambda i: (0, 0))
    w2_spec = pl.BlockSpec((H, E_pad), lambda i: (0, 0))
    b2_spec = pl.BlockSpec((1, E_pad), lambda i: (0, 0))

    flops = 3 * (2 * B * D * H + 2 * B * H * E_pad)
    bytes_accessed = (3 * B * D * 4                 # activations (f32 read)
                      + D * H * 4 + H * E_pad * 4   # weights
                      + (H + E_pad) * 4             # biases
                      + 3 * B * E_pad * 2)          # bf16 output writeback

    o1, o2, o3 = pl.pallas_call(
        _triplet_mlp_kernel,
        out_shape=(
            jax.ShapeDtypeStruct((B, E_pad), jnp.bfloat16),
            jax.ShapeDtypeStruct((B, E_pad), jnp.bfloat16),
            jax.ShapeDtypeStruct((B, E_pad), jnp.bfloat16),
        ),
        grid=(grid_m,),
        in_specs=[x_spec, x_spec, x_spec, w1_spec, b1_spec, w2_spec, b2_spec],
        out_specs=(o_spec, o_spec, o_spec),
        compiler_params=pltpu.CompilerParams(
            dimension_semantics=("parallel",),      # row tiles independent -> v7x dual-TC
        ),
        cost_estimate=pl.CostEstimate(
            flops=flops, transcendentals=0, bytes_accessed=bytes_accessed),
    )(xf1, xf2, xf3, w1, b1, w2_p, b2_p)

    # Per-branch lane slice is tiny (B x E); consumers that can work on the
    # lane-padded slab may skip it entirely.
    return o1[:, :E], o2[:, :E], o3[:, :E]


def init_params(key, d_in, hidden, embed):
    """Deterministic synthetic parameters for the embedding MLP."""
    k1, k2, k3, k4 = jax.random.split(key, 4)
    w1 = jax.random.normal(k1, (d_in, hidden), jnp.float32) * (1.0 / jnp.sqrt(d_in))
    b1 = jax.random.normal(k2, (1, hidden), jnp.float32) * 0.01
    w2 = jax.random.normal(k3, (hidden, embed), jnp.float32) * (1.0 / jnp.sqrt(hidden))
    b2 = jax.random.normal(k4, (1, embed), jnp.float32) * 0.01
    return w1, b1, w2, b2


def _reference_forward(x1, x2, x3, params):
    """Pure-JAX f32 reference of the same embedding net."""
    w1, b1, w2, b2 = params

    def emb(x):
        xf = x.reshape(x.shape[0], -1).astype(jnp.float32)
        h = jnp.maximum(xf @ w1 + b1, 0.0)
        return h @ w2 + b2

    return emb(x1), emb(x2), emb(x3)


if __name__ == "__main__":
    # Small shapes consistent with an image-triplet embedding net.
    B, C, Hh, Ww = 2, 4, 16, 16            # NCHW
    D_IN = C * Hh * Ww                     # 1024
    HIDDEN, EMBED = 128, 32

    key = jax.random.PRNGKey(0)
    kx1, kx2, kx3, kp = jax.random.split(key, 4)
    x1 = jax.random.normal(kx1, (B, C, Hh, Ww), jnp.float32)
    x2 = jax.random.normal(kx2, (B, C, Hh, Ww), jnp.float32)
    x3 = jax.random.normal(kx3, (B, C, Hh, Ww), jnp.float32)

    params = init_params(kp, D_IN, HIDDEN, EMBED)

    o1, o2, o3 = triplet_net_forward(x1, x2, x3, params)
    jax.block_until_ready((o1, o2, o3))

    r1, r2, r3 = _reference_forward(x1, x2, x3, params)
    assert o1.shape == (B, EMBED) and o2.shape == (B, EMBED) and o3.shape == (B, EMBED)
    # bf16 MXU inputs + bf16 embedding output (f32 accumulation) vs f32 reference
    # -> loose tolerance.  Keep the output f32 if the triplet loss needs it.
    assert jnp.allclose(o1.astype(jnp.float32), r1, atol=5e-2, rtol=5e-2)
    assert jnp.allclose(o2.astype(jnp.float32), r2, atol=5e-2, rtol=5e-2)
    assert jnp.allclose(o3.astype(jnp.float32), r3, atol=5e-2, rtol=5e-2)

    print("KERNEL_OK")
</pallas_src>

<mosaic_0001>
module attributes {stable_mosaic.version = 11 : i64} {
  func.func @_triplet_mlp_kernel(%arg0: i32, %arg1: memref<2x1024xf32, #tpu.memory_space<vmem>>, %arg2: memref<2x1024xf32, #tpu.memory_space<vmem>>, %arg3: memref<2x1024xf32, #tpu.memory_space<vmem>>, %arg4: memref<1024x128xf32, #tpu.memory_space<vmem>>, %arg5: memref<1x128xf32, #tpu.memory_space<vmem>>, %arg6: memref<128x128xf32, #tpu.memory_space<vmem>>, %arg7: memref<1x128xf32, #tpu.memory_space<vmem>>, %arg8: memref<2x128xbf16, #tpu.memory_space<vmem>>, %arg9: memref<2x128xbf16, #tpu.memory_space<vmem>>, %arg10: memref<2x128xbf16, #tpu.memory_space<vmem>>) attributes {dimension_semantics = [#tpu.dimension_semantics<parallel>], iteration_bounds = array<i64: 1>, scalar_prefetch = 0 : i64, scratch_operands = 0 : i64, tpu.core_type = #tpu.core_type<tc>, window_params = [{transform_indices = @transform_0, window_bounds = array<i64: 2, 1024>}, {transform_indices = @transform_1, window_bounds = array<i64: 2, 1024>}, {transform_indices = @transform_2, window_bounds = array<i64: 2, 1024>}, {pipeline_mode = #tpu.pipeline_mode<synchronous>, transform_indices = @transform_3, window_bounds = array<i64: 1024, 128>}, {pipeline_mode = #tpu.pipeline_mode<synchronous>, transform_indices = @transform_4, window_bounds = array<i64: 1, 128>}, {pipeline_mode = #tpu.pipeline_mode<synchronous>, transform_indices = @transform_5, window_bounds = array<i64: 128, 128>}, {pipeline_mode = #tpu.pipeline_mode<synchronous>, transform_indices = @transform_6, window_bounds = array<i64: 1, 128>}, {transform_indices = @transform_7, window_bounds = array<i64: 2, 128>}, {transform_indices = @transform_8, window_bounds = array<i64: 2, 128>}, {transform_indices = @transform_9, window_bounds = array<i64: 2, 128>}]} {
    %c0 = arith.constant 0 : index
    %c0_0 = arith.constant 0 : index
    %0 = vector.load %arg4[%c0, %c0_0] : memref<1024x128xf32, #tpu.memory_space<vmem>>, vector<1024x128xf32>
    %1 = arith.truncf %0 : vector<1024x128xf32> to vector<1024x128xbf16>
    %c0_1 = arith.constant 0 : index
    %c0_2 = arith.constant 0 : index
    %2 = vector.load %arg5[%c0_1, %c0_2] : memref<1x128xf32, #tpu.memory_space<vmem>>, vector<1x128xf32>
    %c0_3 = arith.constant 0 : index
    %c0_4 = arith.constant 0 : index
    %3 = vector.load %arg6[%c0_3, %c0_4] : memref<128x128xf32, #tpu.memory_space<vmem>>, vector<128x128xf32>
    %4 = arith.truncf %3 : vector<128x128xf32> to vector<128x128xbf16>
    %c0_5 = arith.constant 0 : index
    %c0_6 = arith.constant 0 : index
    %5 = vector.load %arg7[%c0_5, %c0_6] : memref<1x128xf32, #tpu.memory_space<vmem>>, vector<1x128xf32>
    %c0_7 = arith.constant 0 : index
    %c0_8 = arith.constant 0 : index
    %6 = vector.load %arg1[%c0_7, %c0_8] : memref<2x1024xf32, #tpu.memory_space<vmem>>, vector<2x1024xf32>
    %7 = arith.truncf %6 : vector<2x1024xf32> to vector<2x1024xbf16>
    %cst = arith.constant dense<0.000000e+00> : vector<2x128xf32>
    %8 = tpu.matmul %7, %1, %cst {dimension_numbers = #tpu.dot_dimension_numbers<[1], [0], [0], [1], [0, 0, 1, 1], [], []>} : vector<2x1024xbf16>, vector<1024x128xbf16>, vector<2x128xf32> -> vector<2x128xf32>
    %9 = vector.broadcast %2 : vector<1x128xf32> to vector<2x128xf32>
    %10 = arith.addf %8, %9 : vector<2x128xf32>
    %cst_9 = arith.constant 0.000000e+00 : f32
    %11 = vector.broadcast %cst_9 : f32 to vector<2x128xf32>
    %12 = arith.maximumf %10, %11 : vector<2x128xf32>
    %13 = arith.truncf %12 : vector<2x128xf32> to vector<2x128xbf16>
    %cst_10 = arith.constant dense<0.000000e+00> : vector<2x128xf32>
    %14 = tpu.matmul %13, %4, %cst_10 {dimension_numbers = #tpu.dot_dimension_numbers<[1], [0], [0], [1], [0, 0, 1, 1], [], []>} : vector<2x128xbf16>, vector<128x128xbf16>, vector<2x128xf32> -> vector<2x128xf32>
    %15 = vector.broadcast %5 : vector<1x128xf32> to vector<2x128xf32>
    %16 = arith.addf %14, %15 : vector<2x128xf32>
    %17 = arith.truncf %16 : vector<2x128xf32> to vector<2x128xbf16>
    %c0_11 = arith.constant 0 : index
    %c0_12 = arith.constant 0 : index
    %18 = vector.load %arg8[%c0_11, %c0_12] : memref<2x128xbf16, #tpu.memory_space<vmem>>, vector<2x128xbf16>
    tpu.vector_store %arg8[%c0_11, %c0_12], %17 {strides = array<i32>} : memref<2x128xbf16, #tpu.memory_space<vmem>>, vector<2x128xbf16>,
    %c0_13 = arith.constant 0 : index
    %c0_14 = arith.constant 0 : index
    %19 = vector.load %arg2[%c0_13, %c0_14] : memref<2x1024xf32, #tpu.memory_space<vmem>>, vector<2x1024xf32>
    %20 = arith.truncf %19 : vector<2x1024xf32> to vector<2x1024xbf16>
    %cst_15 = arith.constant dense<0.000000e+00> : vector<2x128xf32>
    %21 = tpu.matmul %20, %1, %cst_15 {dimension_numbers = #tpu.dot_dimension_numbers<[1], [0], [0], [1], [0, 0, 1, 1], [], []>} : vector<2x1024xbf16>, vector<1024x128xbf16>, vector<2x128xf32> -> vector<2x128xf32>
    %22 = vector.broadcast %2 : vector<1x128xf32> to vector<2x128xf32>
    %23 = arith.addf %21, %22 : vector<2x128xf32>
    %cst_16 = arith.constant 0.000000e+00 : f32
    %24 = vector.broadcast %cst_16 : f32 to vector<2x128xf32>
    %25 = arith.maximumf %23, %24 : vector<2x128xf32>
    %26 = arith.truncf %25 : vector<2x128xf32> to vector<2x128xbf16>
    %cst_17 = arith.constant dense<0.000000e+00> : vector<2x128xf32>
    %27 = tpu.matmul %26, %4, %cst_17 {dimension_numbers = #tpu.dot_dimension_numbers<[1], [0], [0], [1], [0, 0, 1, 1], [], []>} : vector<2x128xbf16>, vector<128x128xbf16>, vector<2x128xf32> -> vector<2x128xf32>
    %28 = vector.broadcast %5 : vector<1x128xf32> to vector<2x128xf32>
    %29 = arith.addf %27, %28 : vector<2x128xf32>
    %30 = arith.truncf %29 : vector<2x128xf32> to vector<2x128xbf16>
    %c0_18 = arith.constant 0 : index
    %c0_19 = arith.constant 0 : index
    %31 = vector.load %arg9[%c0_18, %c0_19] : memref<2x128xbf16, #tpu.memory_space<vmem>>, vector<2x128xbf16>
    tpu.vector_store %arg9[%c0_18, %c0_19], %30 {strides = array<i32>} : memref<2x128xbf16, #tpu.memory_space<vmem>>, vector<2x128xbf16>,
    %c0_20 = arith.constant 0 : index
    %c0_21 = arith.constant 0 : index
    %32 = vector.load %arg3[%c0_20, %c0_21] : memref<2x1024xf32, #tpu.memory_space<vmem>>, vector<2x1024xf32>
    %33 = arith.truncf %32 : vector<2x1024xf32> to vector<2x1024xbf16>
    %cst_22 = arith.constant dense<0.000000e+00> : vector<2x128xf32>
    %34 = tpu.matmul %33, %1, %cst_22 {dimension_numbers = #tpu.dot_dimension_numbers<[1], [0], [0], [1], [0, 0, 1, 1], [], []>} : vector<2x1024xbf16>, vector<1024x128xbf16>, vector<2x128xf32> -> vector<2x128xf32>
    %35 = vector.broadcast %2 : vector<1x128xf32> to vector<2x128xf32>
    %36 = arith.addf %34, %35 : vector<2x128xf32>
    %cst_23 = arith.constant 0.000000e+00 : f32
    %37 = vector.broadcast %cst_23 : f32 to vector<2x128xf32>
    %38 = arith.maximumf %36, %37 : vector<2x128xf32>
    %39 = arith.truncf %38 : vector<2x128xf32> to vector<2x128xbf16>
    %cst_24 = arith.constant dense<0.000000e+00> : vector<2x128xf32>
    %40 = tpu.matmul %39, %4, %cst_24 {dimension_numbers = #tpu.dot_dimension_numbers<[1], [0], [0], [1], [0, 0, 1, 1], [], []>} : vector<2x128xbf16>, vector<128x128xbf16>, vector<2x128xf32> -> vector<2x128xf32>
    %41 = vector.broadcast %5 : vector<1x128xf32> to vector<2x128xf32>
    %42 = arith.addf %40, %41 : vector<2x128xf32>
    %43 = arith.truncf %42 : vector<2x128xf32> to vector<2x128xbf16>
    %c0_25 = arith.constant 0 : index
    %c0_26 = arith.constant 0 : index
    %44 = vector.load %arg10[%c0_25, %c0_26] : memref<2x128xbf16, #tpu.memory_space<vmem>>, vector<2x128xbf16>
    tpu.vector_store %arg10[%c0_25, %c0_26], %43 {strides = array<i32>} : memref<2x128xbf16, #tpu.memory_space<vmem>>, vector<2x128xbf16>,
    return
  }
  func.func @transform_0(%arg0: i32) -> (i32, i32) {
    %c0_i32 = arith.constant 0 : i32
    %c0_i32_0 = arith.constant 0 : i32
    return %arg0, %c0_i32 : i32, i32
  }
  func.func @transform_1(%arg0: i32) -> (i32, i32) {
    %c0_i32 = arith.constant 0 : i32
    %c0_i32_0 = arith.constant 0 : i32
    return %arg0, %c0_i32 : i32, i32
  }
  func.func @transform_2(%arg0: i32) -> (i32, i32) {
    %c0_i32 = arith.constant 0 : i32
    %c0_i32_0 = arith.constant 0 : i32
    return %arg0, %c0_i32 : i32, i32
  }
  func.func @transform_3(%arg0: i32) -> (i32, i32) {
    %c0_i32 = arith.constant 0 : i32
    %c0_i32_0 = arith.constant 0 : i32
    %c0_i32_1 = arith.constant 0 : i32
    return %c0_i32, %c0_i32_0 : i32, i32
  }
  func.func @transform_4(%arg0: i32) -> (i32, i32) {
    %c0_i32 = arith.constant 0 : i32
    %c0_i32_0 = arith.constant 0 : i32
    %c0_i32_1 = arith.constant 0 : i32
    return %c0_i32, %c0_i32_0 : i32, i32
  }
  func.func @transform_5(%arg0: i32) -> (i32, i32) {
    %c0_i32 = arith.constant 0 : i32
    %c0_i32_0 = arith.constant 0 : i32
    %c0_i32_1 = arith.constant 0 : i32
    return %c0_i32, %c0_i32_0 : i32, i32
  }
  func.func @transform_6(%arg0: i32) -> (i32, i32) {
    %c0_i32 = arith.constant 0 : i32
    %c0_i32_0 = arith.constant 0 : i32
    %c0_i32_1 = arith.constant 0 : i32
    return %c0_i32, %c0_i32_0 : i32, i32
  }
  func.func @transform_7(%arg0: i32) -> (i32, i32) {
    %c0_i32 = arith.constant 0 : i32
    %c0_i32_0 = arith.constant 0 : i32
    return %arg0, %c0_i32 : i32, i32
  }
  func.func @transform_8(%arg0: i32) -> (i32, i32) {
    %c0_i32 = arith.constant 0 : i32
    %c0_i32_0 = arith.constant 0 : i32
    return %arg0, %c0_i32 : i32, i32
  }
  func.func @transform_9(%arg0: i32) -> (i32, i32) {
    %c0_i32 = arith.constant 0 : i32
    %c0_i32_0 = arith.constant 0 : i32
    return %arg0, %c0_i32 : i32, i32
  }
}

</mosaic_0001>

<bundles_post_ra>
// kernel: tpu_custom_call.1
= control target key start
LH: loop header
LB: loop body
LE: loop exit
PB: predicated region body
PF: predicated region fallthrough
CT: control target
= control target key end

     0   :  { %15 = vsyncpa [#allocation3], 0  ;;  %s2330_s0 = inlined_call_operand.hbm [shape: f32[2,1024], index: 0, kind: input, shape index: {}]   ;;  %s2331_s1 = inlined_call_operand.hbm [shape: f32[2,1024], index: 1, kind: input, shape index: {}]   ;;  %s2332_s2 = inlined_call_operand.hbm [shape: f32[2,1024], index: 2, kind: input, shape index: {}]   ;;  %s2333_s3 = inlined_call_operand.hbm [shape: f32[1024,128], index: 3, kind: input, shape index: {}]   ;;  %s2334_s4 = inlined_call_operand.vmem [shape: f32[1,128], index: 4, kind: input, shape index: {}]   ;;  %s2335_s5 = inlined_call_operand.hbm [shape: f32[128,128], index: 5, kind: input, shape index: {}]   ;;  %s2336_s6 = inlined_call_operand.vmem [shape: f32[1,128], index: 6, kind: input, shape index: {}]   ;;  %s2337_s7 = inlined_call_operand.hbm [shape: bf16[2,128], index: 7, kind: output, shape index: {0}]   ;;  %s2338_s8 = inlined_call_operand.hbm [shape: bf16[2,128], index: 8, kind: output, shape index: {1}]   ;;  %s2339_s9 = inlined_call_operand.hbm [shape: bf16[2,128], index: 9, kind: output, shape index: {2}]  }
   0x1   :  { %16 = vsyncpa [#allocation6], 0 }
   0x2   :  { %17 = vsyncpa [#allocation9], 0 }
   0x3   :  { %18 = vsyncpa [#allocation4], 0 }
   0x4   :  { %19 = vsyncpa [#allocation13], 0  ;;  %s1700_s30 = smov [#allocation5]   ;;  %s1701_s11 = smov [#allocation8]  }
   0x5   :  { %s36_s10 = sshll.u32 %s1700_s30, 4  ;;  %s55_s12 = sshll.u32 %s1701_s11, 4  ;;  %s37_s10 = int_to_ptr.vmem [resolvable:$true] %s36_s10  ;;  %s1763_s12 = int_to_ptr.vmem [resolvable:$true] %s55_s12 }
   0x6   :  { %s1514_s15 = scalar_lea.hbm %s2331_s1, 256 }
   0x7   :  { %p1515_p0 = scmp.ne.s32.totalorder %s2331_s1, %s1514_s15  ;;  %p1518_p1 = scmp.lt.u32.totalorder %s1514_s15, %s2331_s1 }
   0x9   :  { %p1520_p2 = pnand %p1518_p1, %p1515_p0 }
   0xb   :  { %1523 = shalt.err (!%p1520_p2)
}
   0xc   :  { %s1524_s20 = scalar_lea.vmem %s37_s10, 256  ;;  %p1529_p4 = scmp.lt.s32.totalorder %s37_s10, %s37_s10 }
   0xd   :  { %p1525_p3 = scmp.ne.s32.totalorder %s37_s10, %s1524_s20  ;;  %p1530_p5 = scmp.lt.s32.totalorder %s1524_s20, %s1524_s20 }
   0xf   :  { %p1531_p6 = por %p1530_p5, %p1529_p4 }
  0x11   :  { %p1532_p7 = pnand %p1531_p6, %p1525_p3 }
  0x13   :  { %1535 = shalt.err (!%p1532_p7)
}
  0x14   :  { %39 = dma.hbm_to_vmem [thread:$0]  %s2331_s1, 256, %s37_s10, [#allocation6]  }
  0x15   :  { %s1536_s25 = scalar_lea.hbm %s2333_s3, 16384 }
  0x16   :  { %p1537_p8 = scmp.ne.s32.totalorder %s2333_s3, %s1536_s25  ;;  %p1540_p9 = scmp.lt.u32.totalorder %s1536_s25, %s2333_s3 }
  0x18   :  { %p1542_p10 = pnand %p1540_p9, %p1537_p8 }
  0x1a   :  { %1545 = shalt.err (!%p1542_p10)
}
  0x1b   :  { %s1546_s30 = scalar_lea.vmem %s1763_s12, 16384  ;;  %p1551_p12 = scmp.lt.s32.totalorder %s1763_s12, %s1763_s12 }
  0x1c   :  { %p1547_p11 = scmp.ne.s32.totalorder %s1763_s12, %s1546_s30  ;;  %p1552_p13 = scmp.lt.s32.totalorder %s1546_s30, %s1546_s30 }
  0x1e   :  { %p1553_p0 = por %p1552_p13, %p1551_p12 }
  0x20   :  { %p1554_p1 = pnand %p1553_p0, %p1547_p11 }
  0x22   :  { %1557 = shalt.err (!%p1554_p1)
}
  0x23   :  { %s1702_s1 = smov 128   ;;  %s1703_s10 = smov 8  }
  0x24   :  { %61 = dma.hbm_to_vmem [thread:$0]  %s2333_s3, 16384, %s1763_s12, [#allocation9], %s1702_s1, %s1702_s1, %s1703_s10  }
  0x25   :  { %s1704_s14 = smov [#allocation2]   ;;  %s1705_s16 = smov [#allocation7]  }
  0x26   :  { %s26_s15 = sshll.u32 %s1704_s14, 4  ;;  %s46_s17 = sshll.u32 %s1705_s16, 4  ;;  %s27_s15 = int_to_ptr.vmem [resolvable:$true] %s26_s15  ;;  %s47_s17 = int_to_ptr.vmem [resolvable:$true] %s46_s17 }
  0x27   :  { %s1558_s20 = scalar_lea.hbm %s2330_s0, 256 }
  0x28   :  { %p1559_p2 = scmp.ne.s32.totalorder %s2330_s0, %s1558_s20  ;;  %p1562_p3 = scmp.lt.u32.totalorder %s1558_s20, %s2330_s0 }
  0x2a   :  { %p1564_p4 = pnand %p1562_p3, %p1559_p2 }
  0x2c   :  { %1567 = shalt.err (!%p1564_p4)
}
  0x2d   :  { %s1568_s3 = scalar_lea.vmem %s27_s15, 256  ;;  %p1573_p6 = scmp.lt.s32.totalorder %s27_s15, %s27_s15 }
  0x2e   :  { %p1569_p5 = scmp.ne.s32.totalorder %s27_s15, %s1568_s3  ;;  %p1574_p7 = scmp.lt.s32.totalorder %s1568_s3, %s1568_s3 }
  0x30   :  { %p1575_p8 = por %p1574_p7, %p1573_p6 }
  0x32   :  { %p1576_p9 = pnand %p1575_p8, %p1569_p5 }
  0x34   :  { %1579 = shalt.err (!%p1576_p9)
}
  0x35   :  { %29 = dma.hbm_to_vmem [thread:$0]  %s2330_s0, 256, %s27_s15, [#allocation3]  }
  0x36   :  { %s1580_s28 = scalar_lea.hbm %s2332_s2, 256 }
  0x37   :  { %p1581_p10 = scmp.ne.s32.totalorder %s2332_s2, %s1580_s28  ;;  %p1584_p11 = scmp.lt.u32.totalorder %s1580_s28, %s2332_s2 }
  0x39   :  { %p1586_p12 = pnand %p1584_p11, %p1581_p10 }
  0x3b   :  { %1589 = shalt.err (!%p1586_p12)
}
  0x3c   :  { %s1590_s14 = scalar_lea.vmem %s47_s17, 256  ;;  %p1595_p0 = scmp.lt.s32.totalorder %s47_s17, %s47_s17 }
  0x3d   :  { %p1591_p13 = scmp.ne.s32.totalorder %s47_s17, %s1590_s14  ;;  %p1596_p1 = scmp.lt.s32.totalorder %s1590_s14, %s1590_s14 }
  0x3f   :  { %p1597_p2 = por %p1596_p1, %p1595_p0 }
  0x41   :  { %p1598_p3 = pnand %p1597_p2, %p1591_p13 }
  0x43   :  { %1601 = shalt.err (!%p1598_p3)
}
  0x44   :  { %49 = dma.hbm_to_vmem [thread:$0]  %s2332_s2, 256, %s47_s17, [#allocation6]  }
  0x45   :  { %s1706_s16 = smov [#allocation10]   ;;  %s1602_s21 = scalar_lea.hbm %s2335_s5, 2048 }
  0x46   :  { %s69_s18 = sshll.u32 %s1706_s16, 4  ;;  %p1603_p4 = scmp.ne.s32.totalorder %s2335_s5, %s1602_s21  ;;  %s70_s18 = int_to_ptr.vmem [resolvable:$true] %s69_s18 }
  0x47   :  { %p1606_p5 = scmp.lt.u32.totalorder %s1602_s21, %s2335_s5 }
  0x49   :  { %p1608_p6 = pnand %p1606_p5, %p1603_p4 }
  0x4b   :  { %1611 = shalt.err (!%p1608_p6)
}
  0x4c   :  { %s1612_s12 = scalar_lea.vmem %s70_s18, 2048  ;;  %p1617_p8 = scmp.lt.s32.totalorder %s70_s18, %s70_s18 }
  0x4d   :  { %p1613_p7 = scmp.ne.s32.totalorder %s70_s18, %s1612_s12  ;;  %p1618_p9 = scmp.lt.s32.totalorder %s1612_s12, %s1612_s12 }
  0x4f   :  { %p1619_p10 = por %p1618_p9, %p1617_p8 }
  0x51   :  { %p1620_p11 = pnand %p1619_p10, %p1613_p7 }
  0x53   :  { %1623 = shalt.err (!%p1620_p11)
}
  0x54   :  { %75 = dma.hbm_to_vmem [thread:$0]  %s2335_s5, 2048, %s70_s18, [#allocation9], %s1702_s1, %s1702_s1, %s1703_s10  }
  0x55   :  { %1690 = dma.done.wait [#allocation3], 256  }
  0x56   :  { %1691 = vsyncadd [#allocation3], 4294967040 }
  0x57   :  { %1692 = dma.done.wait [#allocation6], 512  }
  0x58   :  { %1693 = vsyncadd [#allocation6], 4294966784 }
  0x59   :  { %1694 = dma.done.wait [#allocation9], 18432  }
  0x5a   :  { %1695 = vsyncadd [#allocation9], 4294948864  ;;  %v110_v0 = vld [vmem:[#allocation8 + $0x80] sm:$0xff]  ;;  %v111_v1 = vld [vmem:[#allocation8 + $0x88] sm:$0xff]  ;;  %v1707_v47 = vmov 1983009808   ;;  %v320_v49 = vlaneseq }
  0x5b   :  { %v142_v2 = vld [vmem:[#allocation8 + $0x180] sm:$0xff]  ;;  %v1836_v3 = vpack.c.bf16 %v111_v1, %v110_v0  ;;  %v143_v4 = vld [vmem:[#allocation8 + $0x188] sm:$0xff]  ;;  %v112_v11 = vld [vmem:[#allocation8 + $0x90] sm:$0xff]  ;;  %v318_v48 = vunpack.c.l.s4 %v1707_v47  ;;  %vm1709_vm0 = vmmov 0   ;;  %s1711_s26 = smov [#allocation11]  }
  0x5c   :  { %v94_v5 = vld [vmem:[#allocation8] sm:$0xff]  ;;  %v95_v6 = vld [vmem:[#allocation8 + $0x8] sm:$0xff]  ;;  %v1838_v7 = vpack.c.bf16 %v143_v4, %v142_v2  ;;  %v113_v13 = vld [vmem:[#allocation8 + $0x98] sm:$0xff]  ;;  %v321_v0 = vshrl.u32 %v320_v49, 7  ;;  %s1104_s27 = sshll.u32 %s1711_s26, 4  ;;  %s1105_s27 = int_to_ptr.vmem [resolvable:$true] %s1104_s27 }
  0x5d   :  { %v1840_v8 = vpack.c.bf16 %v95_v6, %v94_v5  ;;  %v126_v9 = vld [vmem:[#allocation8 + $0x100] sm:$0xff]  ;;  %v127_v10 = vld [vmem:[#allocation8 + $0x108] sm:$0xff]  ;;  %1144 = vmatprep.subr.bf16.mxu0 %v1836_v3  ;;  %v144_v14 = vld [vmem:[#allocation8 + $0x190] sm:$0xff]  ;;  %v1847_v16 = vpack.c.bf16 %v113_v13, %v112_v11  ;;  %v319_v63 = vunpack.c.0.s8 %v318_v48 }
  0x5e   :  { %v1843_v12 = vpack.c.bf16 %v127_v10, %v126_v9  ;;  %v145_v15 = vld [vmem:[#allocation8 + $0x198] sm:$0xff]  ;;  %1166 = vmatprep.subr.bf16.mxu1 %v1838_v7  ;;  %v96_v18 = vld [vmem:[#allocation8 + $0x10] sm:$0xff]  ;;  %v114_v23 = vld [vmem:[#allocation8 + $0xa0] sm:$0xff] }
  0x5f   :  { %1145 = vmatpush3.bf16.msra.mxu0 %v1840_v8  ;;  %v1849_v17 = vpack.c.bf16 %v145_v15, %v144_v14  ;;  %v97_v19 = vld [vmem:[#allocation8 + $0x18] sm:$0xff]  ;;  %v128_v20 = vld [vmem:[#allocation8 + $0x110] sm:$0xff]  ;;  %v115_v24 = vld [vmem:[#allocation8 + $0xa8] sm:$0xff] }
  0x60   :  { %1167 = vmatpush3.bf16.msra.mxu1 %v1843_v12  ;;  %v1852_v21 = vpack.c.bf16 %v97_v19, %v96_v18  ;;  %v129_v22 = vld [vmem:[#allocation8 + $0x118] sm:$0xff]  ;;  %1146 = vmatprep.subr.bf16.mxu0 %v1847_v16  ;;  %v1858_v26 = vpack.c.bf16 %v115_v24, %v114_v23  ;;  %v146_v27 = vld [vmem:[#allocation8 + $0x1a0] sm:$0xff]  ;;  %v147_v28 = vld [vmem:[#allocation8 + $0x1a8] sm:$0xff]  ;;  %v1898_v19 = vsub.s32 %v319_v63, %v321_v0 }
  0x61   :  { %1168 = vmatprep.subr.bf16.mxu1 %v1849_v17  ;;  %v1856_v25 = vpack.c.bf16 %v129_v22, %v128_v20  ;;  %v98_v29 = vld [vmem:[#allocation8 + $0x20] sm:$0xff]  ;;  %v1860_v30 = vpack.c.bf16 %v147_v28, %v146_v27  ;;  %v99_v31 = vld [vmem:[#allocation8 + $0x28] sm:$0xff]  ;;  %v116_v35 = vld [vmem:[#allocation8 + $0xb0] sm:$0xff] }
  0x62   :  { %v130_v32 = vld [vmem:[#allocation8 + $0x120] sm:$0xff]  ;;  %v131_v33 = vld [vmem:[#allocation8 + $0x128] sm:$0xff]  ;;  %v1863_v34 = vpack.c.bf16 %v99_v31, %v98_v29  ;;  %v117_v36 = vld [vmem:[#allocation8 + $0xb8] sm:$0xff] }
  0x63   :  { %1147 = vmatpush3.bf16.msra.mxu0 %v1852_v21  ;;  %v148_v37 = vld [vmem:[#allocation8 + $0x1b0] sm:$0xff]  ;;  %v1867_v38 = vpack.c.bf16 %v131_v33, %v130_v32  ;;  %v1869_v39 = vpack.c.bf16 %v117_v36, %v116_v35  ;;  %v149_v40 = vld [vmem:[#allocation8 + $0x1b8] sm:$0xff]  ;;  %v118_v46 = vld [vmem:[#allocation8 + $0xc0] sm:$0xff] }
  0x64   :  { %1169 = vmatpush3.bf16.msra.mxu1 %v1856_v25  ;;  %1148 = vmatprep.subr.bf16.mxu0 %v1858_v26  ;;  %v100_v41 = vld [vmem:[#allocation8 + $0x30] sm:$0xff]  ;;  %v101_v42 = vld [vmem:[#allocation8 + $0x38] sm:$0xff]  ;;  %v1872_v43 = vpack.c.bf16 %v149_v40, %v148_v37  ;;  %v119_v50 = vld [vmem:[#allocation8 + $0xc8] sm:$0xff] }
  0x65   :  { %1170 = vmatprep.subr.bf16.mxu1 %v1860_v30  ;;  %v132_v44 = vld [vmem:[#allocation8 + $0x130] sm:$0xff]  ;;  %v133_v45 = vld [vmem:[#allocation8 + $0x138] sm:$0xff]  ;;  %v150_v51 = vld [vmem:[#allocation8 + $0x1c0] sm:$0xff]  ;;  %v1875_v53 = vpack.c.bf16 %v101_v42, %v100_v41  ;;  %v1881_v55 = vpack.c.bf16 %v119_v50, %v118_v46 }
  0x66   :  { %v151_v52 = vld [vmem:[#allocation8 + $0x1c8] sm:$0xff]  ;;  %v1879_v54 = vpack.c.bf16 %v133_v45, %v132_v44  ;;  %v102_v56 = vld [vmem:[#allocation8 + $0x40] sm:$0xff]  ;;  %v120_v61 = vld [vmem:[#allocation8 + $0xd0] sm:$0xff] }
  0x67   :  { %1149 = vmatpush3.bf16.msra.mxu0 %v1863_v34  ;;  %v103_v57 = vld [vmem:[#allocation8 + $0x48] sm:$0xff]  ;;  %v134_v58 = vld [vmem:[#allocation8 + $0x140] sm:$0xff]  ;;  %v1884_v59 = vpack.c.bf16 %v151_v52, %v150_v51  ;;  %v121_v62 = vld [vmem:[#allocation8 + $0xd8] sm:$0xff] }
  0x68   :  { %1171 = vmatpush3.bf16.msra.mxu1 %v1867_v38  ;;  %1150 = vmatprep.subr.bf16.mxu0 %v1869_v39  ;;  %v135_v60 = vld [vmem:[#allocation8 + $0x148] sm:$0xff]  ;;  %v152_v1 = vld [vmem:[#allocation8 + $0x1d0] sm:$0xff]  ;;  %v153_v2 = vld [vmem:[#allocation8 + $0x1d8] sm:$0xff]  ;;  %v1887_v4 = vpack.c.bf16 %v103_v57, %v102_v56  ;;  %v1893_v6 = vpack.c.bf16 %v121_v62, %v120_v61 }
  0x69   :  { %1172 = vmatprep.subr.bf16.mxu1 %v1872_v43  ;;  %v1891_v5 = vpack.c.bf16 %v135_v60, %v134_v58  ;;  %v104_v9 = vld [vmem:[#allocation8 + $0x50] sm:$0xff]  ;;  %v105_v10 = vld [vmem:[#allocation8 + $0x58] sm:$0xff]  ;;  %v1896_v13 = vpack.c.bf16 %v153_v2, %v152_v1  ;;  %v122_v15 = vld [vmem:[#allocation8 + $0xe0] sm:$0xff] }
  0x6a   :  { %v136_v11 = vld [vmem:[#allocation8 + $0x150] sm:$0xff]  ;;  %v137_v14 = vld [vmem:[#allocation8 + $0x158] sm:$0xff]  ;;  %v123_v18 = vld [vmem:[#allocation8 + $0xe8] sm:$0xff]  ;;  %v1901_v23 = vpack.c.bf16 %v105_v10, %v104_v9 }
  0x6b   :  { %1151 = vmatpush3.bf16.msra.mxu0 %v1875_v53  ;;  %v154_v20 = vld [vmem:[#allocation8 + $0x1e0] sm:$0xff]  ;;  %v155_v22 = vld [vmem:[#allocation8 + $0x1e8] sm:$0xff]  ;;  %v1905_v27 = vpack.c.bf16 %v137_v14, %v136_v11  ;;  %v1907_v28 = vpack.c.bf16 %v123_v18, %v122_v15  ;;  %v312_v32 = vld [vmem:[#allocation2] sm:$0xff] }
  0x6c   :  { %1173 = vmatpush3.bf16.msra.mxu1 %v1879_v54  ;;  %1152 = vmatprep.subr.bf16.mxu0 %v1881_v55  ;;  %v106_v24 = vld [vmem:[#allocation8 + $0x60] sm:$0xff]  ;;  %v107_v29 = vld [vmem:[#allocation8 + $0x68] sm:$0xff]  ;;  %v1910_v33 = vpack.c.bf16 %v155_v22, %v154_v20  ;;  %v124_v36 = vld [vmem:[#allocation8 + $0xf0] sm:$0xff]  ;;  %v323_v40 = vrot.slane %v312_v32, %v1898_v19  ;;  %v316_v41 = vcombine.high %v312_v32, %v312_v32 }
  0x6d   :  { %1174 = vmatprep.subr.bf16.mxu1 %v1884_v59  ;;  %v138_v31 = vld [vmem:[#allocation8 + $0x160] sm:$0xff]  ;;  %v139_v35 = vld [vmem:[#allocation8 + $0x168] sm:$0xff]  ;;  %v125_v37 = vld [vmem:[#allocation8 + $0xf8] sm:$0xff]  ;;  %v1914_v45 = vpack.c.bf16 %v107_v29, %v106_v24 }
  0x6e   :  { %v156_v42 = vld [vmem:[#allocation8 + $0x1f0] sm:$0xff]  ;;  %v157_v44 = vld [vmem:[#allocation8 + $0x1f8] sm:$0xff]  ;;  %v331_v46 = vcombine.high %v323_v40, %v323_v40  ;;  %v330_v47 = vrot.slane %v316_v41, %v1898_v19  ;;  %v1919_v48 = vpack.c.bf16 %v139_v35, %v138_v31  ;;  %v1921_v49 = vpack.c.bf16 %v125_v37, %v124_v36  ;;  %v174_v61 = vld [vmem:[#allocation8 + $0x280] sm:$0xff] }
  0x6f   :  { %1153 = vmatpush3.bf16.msra.mxu0 %v1887_v4  ;;  %2385 = vst [vmem:[#allocation20_spill] sm:$0xff] %v1914_v45  ;;  %v108_v50 = vld [vmem:[#allocation8 + $0x70] sm:$0xff]  ;;  %v109_v51 = vld [vmem:[#allocation8 + $0x78] sm:$0xff]  ;;  %v1924_v56 = vpack.c.bf16 %v157_v44, %v156_v42  ;;  %v175_v62 = vld [vmem:[#allocation8 + $0x288] sm:$0xff]  ;;  %v358_v29 = vpack.c.bf16 %v323_v40, %v323_v40 }
  0x70   :  { %1175 = vmatpush3.bf16.msra.mxu1 %v1891_v5  ;;  %1154 = vmatprep.subr.bf16.mxu0 %v1893_v6  ;;  %2386 = vst [vmem:[#allocation21_spill] sm:$0xff] %v1921_v49  ;;  %v140_v52 = vld [vmem:[#allocation8 + $0x170] sm:$0xff]  ;;  %v141_v57 = vld [vmem:[#allocation8 + $0x178] sm:$0xff]  ;;  %v359_v58 = vpack.c.bf16 %v331_v46, %v331_v46  ;;  %v332_v60 = vcombine.high %v330_v47, %v330_v47  ;;  %v206_v63 = vld [vmem:[#allocation8 + $0x380] sm:$0xff] }
  0x71   :  { %1176 = vmatprep.subr.bf16.mxu1 %v1896_v13  ;;  %2387 = vst [vmem:[#allocation22_spill] sm:$0xff] %v1924_v56  ;;  %v207_v0 = vld [vmem:[#allocation8 + $0x388] sm:$0xff]  ;;  %v1927_v1 = vpack.c.bf16 %v109_v51, %v108_v50  ;;  %v1931_v9 = vpack.c.bf16 %v141_v57, %v140_v52  ;;  %v1933_v10 = vpack.c.bf16 %v175_v62, %v174_v61  ;;  %v158_v11 = vld [vmem:[#allocation8 + $0x200] sm:$0xff]  ;;  %v176_v22 = vld [vmem:[#allocation8 + $0x290] sm:$0xff] }
  0x72   :  { %404 = vmatprep.mubr.bf16.mxu0 %v359_v58  ;;  %v361_v2 = vpack.c.bf16 %v332_v60, %v332_v60  ;;  %v159_v14 = vld [vmem:[#allocation8 + $0x208] sm:$0xff]  ;;  %v190_v15 = vld [vmem:[#allocation8 + $0x300] sm:$0xff]  ;;  %v1936_v18 = vpack.c.bf16 %v207_v0, %v206_v63  ;;  %v177_v24 = vld [vmem:[#allocation8 + $0x298] sm:$0xff]  ;;  %v360_v35 = vpack.c.bf16 %v330_v47, %v330_v47 }
  0x73   :  { %1155 = vmatpush3.bf16.msra.mxu0 %v1901_v23  ;;  %2388 = vst [vmem:[#allocation23_spill] sm:$0xff] %v1927_v1  ;;  %2389 = vst [vmem:[#allocation24_spill] sm:$0xff] %v1931_v9  ;;  %v191_v20 = vld [vmem:[#allocation8 + $0x308] sm:$0xff]  ;;  %v208_v31 = vld [vmem:[#allocation8 + $0x390] sm:$0xff]  ;;  %v1939_v36 = vpack.c.bf16 %v159_v14, %v158_v11  ;;  %v1945_v41 = vpack.c.bf16 %v177_v24, %v176_v22 }
  0x74   :  { %1177 = vmatpush3.bf16.msra.mxu1 %v1905_v27  ;;  %1156 = vmatprep.subr.bf16.mxu0 %v1907_v28  ;;  %2390 = vst [vmem:[#allocation25_spill] sm:$0xff] %v1933_v10  ;;  %2391 = vst [vmem:[#allocation26_spill] sm:$0xff] %v1936_v18  ;;  %v209_v32 = vld [vmem:[#allocation8 + $0x398] sm:$0xff]  ;;  %v1943_v37 = vpack.c.bf16 %v191_v20, %v190_v15  ;;  %v160_v42 = vld [vmem:[#allocation8 + $0x210] sm:$0xff] }
  0x75   :  { %1178 = vmatprep.subr.bf16.mxu1 %v1910_v33  ;;  %444 = vmatprep.mubr.bf16.mxu1 %v361_v2  ;;  %v161_v44 = vld [vmem:[#allocation8 + $0x218] sm:$0xff]  ;;  %v192_v46 = vld [vmem:[#allocation8 + $0x310] sm:$0xff]  ;;  %v1948_v40 = vpack.c.bf16 %v209_v32, %v208_v31  ;;  %v178_v51 = vld [vmem:[#allocation8 + $0x2a0] sm:$0xff] }
  0x76   :  { %2392 = vst [vmem:[#allocation27_spill] sm:$0xff] %v1943_v37  ;;  %v193_v50 = vld [vmem:[#allocation8 + $0x318] sm:$0xff]  ;;  %v179_v47 = vld [vmem:[#allocation8 + $0x2a8] sm:$0xff]  ;;  %v210_v52 = vld [vmem:[#allocation8 + $0x3a0] sm:$0xff]  ;;  %v1951_v58 = vpack.c.bf16 %v161_v44, %v160_v42 }
  0x77   :  { %1157 = vmatpush3.bf16.msra.mxu0 %v1914_v45  ;;  %2393 = vst [vmem:[#allocation28_spill] sm:$0xff] %v1948_v40  ;;  %v211_v57 = vld [vmem:[#allocation8 + $0x3a8] sm:$0xff]  ;;  %v1955_v60 = vpack.c.bf16 %v193_v50, %v192_v46  ;;  %v1957_v61 = vpack.c.bf16 %v179_v47, %v178_v51  ;;  %v162_v62 = vld [vmem:[#allocation8 + $0x220] sm:$0xff]  ;;  %v180_v14 = vld [vmem:[#allocation8 + $0x2b0] sm:$0xff] }
  0x78   :  { %1179 = vmatpush3.bf16.msra.mxu1 %v1919_v48  ;;  %1158 = vmatprep.subr.bf16.mxu0 %v1921_v49  ;;  %v163_v63 = vld [vmem:[#allocation8 + $0x228] sm:$0xff]  ;;  %v194_v0 = vld [vmem:[#allocation8 + $0x320] sm:$0xff]  ;;  %v1960_v2 = vpack.c.bf16 %v211_v57, %v210_v52  ;;  %v181_v15 = vld [vmem:[#allocation8 + $0x2b8] sm:$0xff] }
  0x79   :  { %1180 = vmatprep.subr.bf16.mxu1 %v1924_v56  ;;  %2394 = vst [vmem:[#allocation29_spill] sm:$0xff] %v1955_v60  ;;  %v195_v11 = vld [vmem:[#allocation8 + $0x328] sm:$0xff]  ;;  %v212_v20 = vld [vmem:[#allocation8 + $0x3b0] sm:$0xff]  ;;  %v213_v22 = vld [vmem:[#allocation8 + $0x3b8] sm:$0xff]  ;;  %v1963_v24 = vpack.c.bf16 %v163_v63, %v162_v62  ;;  %v1969_v31 = vpack.c.bf16 %v181_v15, %v180_v14 }
  0x7a   :  { %2395 = vst [vmem:[#allocation30_spill] sm:$0xff] %v1960_v2  ;;  %v164_v32 = vld [vmem:[#allocation8 + $0x230] sm:$0xff]  ;;  %v1972_v44 = vpack.c.bf16 %v213_v22, %v212_v20  ;;  %v197_v46 = vld [vmem:[#allocation8 + $0x338] sm:$0xff]  ;;  %v182_v50 = vld [vmem:[#allocation8 + $0x2c0] sm:$0xff] }
  0x7b   :  { %1159 = vmatpush3.bf16.msra.mxu0 %v1927_v1  ;;  %v196_v42 = vld [vmem:[#allocation8 + $0x330] sm:$0xff]  ;;  %v183_v51 = vld [vmem:[#allocation8 + $0x2c8] sm:$0xff]  ;;  %v214_v47 = vld [vmem:[#allocation8 + $0x3c0] sm:$0xff] }
  0x7c   :  { %1181 = vmatpush3.bf16.msra.mxu1 %v1931_v9  ;;  %1188 = vmatprep.subr.bf16.mxu0 %v1933_v10  ;;  %2397 = vst [vmem:[#allocation32_spill] sm:$0xff] %v1972_v44  ;;  %v215_v52 = vld [vmem:[#allocation8 + $0x3c8] sm:$0xff]  ;;  %v313_v57 = vld [vmem:[#allocation2 + $0x8] sm:$0xff]  ;;  %v1984_v14 = vpack.c.bf16 %v183_v51, %v182_v50  ;;  %v166_v15 = vld [vmem:[#allocation8 + $0x240] sm:$0xff] }
  0x7d   :  { %1210 = vmatprep.subr.bf16.mxu1 %v1936_v18  ;;  %v1978_v63 = vrot.slane %v313_v57, %v1898_v19  ;;  %v167_v20 = vld [vmem:[#allocation8 + $0x248] sm:$0xff]  ;;  %v198_v22 = vld [vmem:[#allocation8 + $0x340] sm:$0xff] }
  0x7e   :  { %405 = vmatmul.mubr.bf16.vlgmr.msra.gmra.mrb[0].mxu0 %v358_v29  ;;  %v1967_v29 = vpack.c.bf16 %v195_v11, %v194_v0  ;;  %v333_v0 = vcombine.high %v313_v57, %v313_v57  ;;  %v1982_v11 = vpack.c.bf16 %v197_v46, %v196_v42  ;;  %v216_v42 = vld [vmem:[#allocation8 + $0x3d0] sm:$0xff]  ;;  %v217_v46 = vld [vmem:[#allocation8 + $0x3d8] sm:$0xff]  ;;  %v1995_v50 = vpack.c.bf16 %v167_v20, %v166_v15  ;;  %v186_v20 = vld [vmem:[#allocation8 + $0x2e0] sm:$0xff] }
  0x7f   :  { %445 = vmatmul.mubr.bf16.vlgmr.msra.gmra.mrb[0].mxu1 %v360_v35  ;;  %1189 = vmatpush3.bf16.msra.mxu0 %v1939_v36  ;;  %v165_v35 = vld [vmem:[#allocation8 + $0x238] sm:$0xff]  ;;  %v348_v57 = vcombine.high %v1978_v63, %v1978_v63  ;;  %v2006_v18 = vpack.c.bf16 %v217_v46, %v216_v42  ;;  %v218_v56 = vld [vmem:[#allocation8 + $0x3e0] sm:$0xff]  ;;  %v171_v42 = vld [vmem:[#allocation8 + $0x268] sm:$0xff] }
  0x80   :  { %1211 = vmatpush3.bf16.msra.mxu1 %v1943_v37  ;;  %1190 = vmatprep.subr.bf16.mxu0 %v1945_v41  ;;  %2396 = vst [vmem:[#allocation31_spill] sm:$0xff] %v1967_v29  ;;  %v1975_v62 = vpack.c.bf16 %v165_v35, %v164_v32  ;;  %2398 = vst [vmem:[#allocation33_spill] sm:$0xff] %v1982_v11  ;;  %v199_v32 = vld [vmem:[#allocation8 + $0x348] sm:$0xff]  ;;  %v184_v35 = vld [vmem:[#allocation8 + $0x2d0] sm:$0xff] }
  0x81   :  { %1212 = vmatprep.subr.bf16.mxu1 %v1948_v40  ;;  %v363_v51 = vpack.c.bf16 %v348_v57, %v348_v57  ;;  %v169_v40 = vld [vmem:[#allocation8 + $0x258] sm:$0xff]  ;;  %v200_v37 = vld [vmem:[#allocation8 + $0x350] sm:$0xff]  ;;  %2401 = vst [vmem:[#allocation36_spill] sm:$0xff] %v2006_v18  ;;  %v187_v57 = vld [vmem:[#allocation8 + $0x2e8] sm:$0xff] }
  0x82   :  { %v201_v15 = vld [vmem:[#allocation8 + $0x358] sm:$0xff]  ;;  %v202_v46 = vld [vmem:[#allocation8 + $0x360] sm:$0xff] }
  0x83   :  { %1191 = vmatpush3.bf16.msra.mxu0 %v1951_v58  ;;  %484 = vmatprep.mubr.bf16.mxu0 %v363_v51 }
  0x84   :  { %1213 = vmatpush3.bf16.msra.mxu1 %v1955_v60  ;;  %1192 = vmatprep.subr.bf16.mxu0 %v1957_v61  ;;  %v185_v60 = vld [vmem:[#allocation8 + $0x2d8] sm:$0xff] }
  0x85   :  { %1214 = vmatprep.subr.bf16.mxu1 %v1960_v2  ;;  %v1987_v2 = vpack.c.bf16 %v215_v52, %v214_v47  ;;  %v2001_v52 = vpack.c.bf16 %v199_v32, %v198_v22  ;;  %v2015_v32 = vpack.c.bf16 %v187_v57, %v186_v20  ;;  %v172_v20 = vld [vmem:[#allocation8 + $0x270] sm:$0xff] }
  0x86   :  { %v204_v57 = vld [vmem:[#allocation8 + $0x370] sm:$0xff] }
  0x87   :  { %1193 = vmatpush3.bf16.msra.mxu0 %v1963_v24  ;;  %2399 = vst [vmem:[#allocation34_spill] sm:$0xff] %v1987_v2  ;;  %2400 = vst [vmem:[#allocation35_spill] sm:$0xff] %v2001_v52 }
  0x88   :  { %1215 = vmatpush3.bf16.msra.mxu1 %v1967_v29  ;;  %1194 = vmatprep.subr.bf16.mxu0 %v1969_v31  ;;  %v1992_v29 = vrot.slane %v333_v0, %v1898_v19  ;;  %v168_v0 = vld [vmem:[#allocation8 + $0x250] sm:$0xff]  ;;  %2403 = vst [vmem:[#allocation38_spill] sm:$0xff] %v2015_v32 }
  0x89   :  { %1216 = vmatprep.subr.bf16.mxu1 %v1972_v44  ;;  %v2003_v44 = vpack.c.bf16 %v185_v60, %v184_v35  ;;  %v2009_v22 = vpack.c.bf16 %v169_v40, %v168_v0  ;;  %v2013_v60 = vpack.c.bf16 %v201_v15, %v200_v37  ;;  %v170_v35 = vld [vmem:[#allocation8 + $0x260] sm:$0xff]  ;;  %v189_v40 = vld [vmem:[#allocation8 + $0x2f8] sm:$0xff]  ;;  %v220_v0 = vld [vmem:[#allocation8 + $0x3f0] sm:$0xff] }
  0x8a   :  { %v349_v47 = vcombine.high %v1992_v29, %v1992_v29 }
  0x8b   :  { %1195 = vmatpush3.bf16.msra.mxu0 %v1975_v62  ;;  %2402 = vst [vmem:[#allocation37_spill] sm:$0xff] %v2009_v22 }
  0x8c   :  { %1217 = vmatpush3.bf16.msra.mxu1 %v1982_v11  ;;  %1196 = vmatprep.subr.bf16.mxu0 %v1984_v14  ;;  %v365_v9 = vpack.c.bf16 %v349_v47, %v349_v47  ;;  %v219_v11 = vld [vmem:[#allocation8 + $0x3e8] sm:$0xff] }
  0x8d   :  { %1218 = vmatprep.subr.bf16.mxu1 %v1987_v2  ;;  %v2018_v51 = vpack.c.bf16 %v219_v11, %v218_v56  ;;  %v203_v47 = vld [vmem:[#allocation8 + $0x368] sm:$0xff]  ;;  %v188_v2 = vld [vmem:[#allocation8 + $0x2f0] sm:$0xff]  ;;  %v173_v56 = vld [vmem:[#allocation8 + $0x278] sm:$0xff] }
  0x8e   :  { %524 = vmatprep.mubr.bf16.mxu1 %v365_v9  ;;  %v221_v9 = vld [vmem:[#allocation8 + $0x3f8] sm:$0xff]  ;;  %v2025_v37 = vpack.c.bf16 %v203_v47, %v202_v46  ;;  %v2027_v15 = vpack.c.bf16 %v189_v40, %v188_v2  ;;  %v362_v2 = vpack.c.bf16 %v1978_v63, %v1978_v63  ;;  %v364_v46 = vpack.c.bf16 %v1992_v29, %v1992_v29  ;;  %v288_v29 = vld [vmem:[#allocation10 + $0x8] sm:$0xff]  ;;  %v289_v63 = vld [vmem:[#allocation10 + $0x10] sm:$0xff] }
  0x8f   :  { %1197 = vmatpush3.bf16.msra.mxu0 %v1995_v50  ;;  %v2030_v11 = vpack.c.bf16 %v221_v9, %v220_v0  ;;  %v2375_v47 = vmov 0.0   ;;  %v290_v0 = vld [vmem:[#allocation10 + $0x18] sm:$0xff] }
  0x90   :  { %1219 = vmatpush3.bf16.msra.mxu1 %v2001_v52  ;;  %1198 = vmatprep.subr.bf16.mxu0 %v2003_v44  ;;  %v2021_v52 = vpack.c.bf16 %v171_v42, %v170_v35  ;;  %2405 = vst [vmem:[#allocation40_spill] sm:$0xff] %v2027_v15  ;;  %v2033_v35 = vpack.c.bf16 %v173_v56, %v172_v20  ;;  %v291_v20 = vld [vmem:[#allocation10 + $0x20] sm:$0xff]  ;;  %v292_v56 = vld [vmem:[#allocation10 + $0x28] sm:$0xff] }
  0x91   :  { %1220 = vmatprep.subr.bf16.mxu1 %v2006_v18  ;;  %v205_v18 = vld [vmem:[#allocation8 + $0x378] sm:$0xff]  ;;  %v2067_v9 = vpack.c.bf16 %v290_v0, %v289_v63  ;;  %v296_v63 = vld [vmem:[#allocation10 + $0x48] sm:$0xff] }
  0x92   :  { %2404 = vst [vmem:[#allocation39_spill] sm:$0xff] %v2021_v52  ;;  %2406 = vst [vmem:[#allocation41_spill] sm:$0xff] %v2033_v35  ;;  %v2037_v42 = vpack.c.bf16 %v205_v18, %v204_v57  ;;  %v287_v18 = vld [vmem:[#allocation10] sm:$0xff]  ;;  %v2071_v57 = vpack.c.bf16 %v292_v56, %v291_v20  ;;  %v297_v20 = vld [vmem:[#allocation10 + $0x50] sm:$0xff] }
  0x93   :  { %1199 = vmatpush3.bf16.msra.mxu0 %v2009_v22  ;;  %v2064_v40 = vpack.c.bf16 %v288_v29, %v287_v18  ;;  %2408 = vst [vmem:[#allocation43_spill] sm:$0xff] %v2067_v9  ;;  %v295_v29 = vld [vmem:[#allocation10 + $0x40] sm:$0xff]  ;;  %v298_v56 = vld [vmem:[#allocation10 + $0x58] sm:$0xff] }
  0x94   :  { %1221 = vmatpush3.bf16.msra.mxu1 %v2013_v60  ;;  %1200 = vmatprep.subr.bf16.mxu0 %v2015_v32  ;;  %2409 = vst [vmem:[#allocation44_spill] sm:$0xff] %v2071_v57  ;;  %v2079_v0 = vpack.c.bf16 %v296_v63, %v295_v29  ;;  %v301_v29 = vld [vmem:[#allocation10 + $0x70] sm:$0xff]  ;;  %v302_v63 = vld [vmem:[#allocation10 + $0x78] sm:$0xff] }
  0x95   :  { %1222 = vmatprep.subr.bf16.mxu1 %v2018_v51  ;;  %2407 = vst [vmem:[#allocation42_spill] sm:$0xff] %v2064_v40 }
  0x96   :  { %2411 = vst [vmem:[#allocation46_spill] sm:$0xff] %v2079_v0 }
  0x97   :  { %1201 = vmatpush3.bf16.msra.mxu0 %v2021_v52 }
  0x98   :  { %1223 = vmatpush3.bf16.msra.mxu1 %v2025_v37  ;;  %1202 = vmatprep.subr.bf16.mxu0 %v2027_v15 }
  0x99   :  { %1224 = vmatprep.subr.bf16.mxu1 %v2030_v11 }
  0x9b   :  { %1203 = vmatpush3.bf16.msra.mxu0 %v2033_v35 }
  0x9c   :  { %1225 = vmatpush3.bf16.msra.mxu1 %v2037_v42  ;;  %1435 = vmatprep.subr.bf16.mxu0 %v2375_v47 }
  0x9d   :  { %1241 = vmatprep.subr.bf16.mxu1 %v1836_v3 }
  0x9e   :  { %485 = vmatmul.mubr.bf16.vlgmr.msra.gmra.mrb[4].mxu0 %v362_v2  ;;  %v293_v2 = vld [vmem:[#allocation10 + $0x30] sm:$0xff] }
  0x9f   :  { %525 = vmatmul.mubr.bf16.vlgmr.msra.gmra.mrb[4].mxu1 %v364_v46  ;;  %1436 = vmatpush3.bf16.msra.mxu0 %v2064_v40  ;;  %v294_v46 = vld [vmem:[#allocation10 + $0x38] sm:$0xff] }
  0xa0   :  { %1242 = vmatpush3.bf16.msra.mxu1 %v1840_v8  ;;  %1437 = vmatprep.subr.bf16.mxu0 %v2375_v47  ;;  %v2075_v18 = vpack.c.bf16 %v294_v46, %v293_v2  ;;  %v299_v2 = vld [vmem:[#allocation10 + $0x60] sm:$0xff]  ;;  %v300_v46 = vld [vmem:[#allocation10 + $0x68] sm:$0xff] }
  0xa1   :  { %1243 = vmatprep.subr.bf16.mxu1 %v1847_v16  ;;  %1451 = vmatprep.mubr.msk.bf16.mxu0 %vm1709_vm0, %v2375_v47 }
  0xa2   :  { %2410 = vst [vmem:[#allocation45_spill] sm:$0xff] %v2075_v18 }
  0xa3   :  { %1438 = vmatpush3.bf16.msra.mxu0 %v2067_v9 }
  0xa4   :  { %1244 = vmatpush3.bf16.msra.mxu1 %v1852_v21  ;;  %1439 = vmatprep.subr.bf16.mxu0 %v2375_v47 }
  0xa5   :  { %1245 = vmatprep.subr.bf16.mxu1 %v1858_v26 }
  0xa7   :  { %1440 = vmatpush3.bf16.msra.mxu0 %v2071_v57 }
  0xa8   :  { %1246 = vmatpush3.bf16.msra.mxu1 %v1863_v34  ;;  %1441 = vmatprep.subr.bf16.mxu0 %v2375_v47 }
  0xa9   :  { %1247 = vmatprep.subr.bf16.mxu1 %v1869_v39 }
  0xab   :  { %1442 = vmatpush3.bf16.msra.mxu0 %v2075_v18 }
  0xac   :  { %1248 = vmatpush3.bf16.msra.mxu1 %v1875_v53  ;;  %1443 = vmatprep.subr.bf16.mxu0 %v2375_v47 }
  0xad   :  { %1249 = vmatprep.subr.bf16.mxu1 %v1881_v55 }
  0xaf   :  { %1444 = vmatpush3.bf16.msra.mxu0 %v2079_v0 }
  0xb0   :  { %1250 = vmatpush3.bf16.msra.mxu1 %v1887_v4  ;;  %1445 = vmatprep.subr.bf16.mxu0 %v2375_v47 }
  0xb1   :  { %1251 = vmatprep.subr.bf16.mxu1 %v1893_v6 }
  0xb4   :  { %1252 = vmatpush3.bf16.msra.mxu1 %v1901_v23 }
  0xb5   :  { %1253 = vmatprep.subr.bf16.mxu1 %v1907_v28 }
  0xb8   :  { %1254 = vmatpush3.bf16.msra.mxu1 %v1914_v45  ;;  %v2094_v45 = vld [vmem:[#allocation5] sm:$0xff] }
  0xb9   :  { %1255 = vmatprep.subr.bf16.mxu1 %v1921_v49  ;;  %v2092_v49 = vpack.c.bf16 %v302_v63, %v301_v29  ;;  %v2114_v29 = vld [vmem:[#allocation5 + $0x8] sm:$0xff] }
  0xba   :  { %v610_v63 = vrot.slane %v2114_v29, %v1898_v19 }
  0xbb   :  { %2414 = vst [vmem:[#allocation49_spill] sm:$0xff] %v2092_v49 }
  0xbc   :  { %1256 = vmatpush3.bf16.msra.mxu1 %v1927_v1  ;;  %v2088_v1 = vpack.c.bf16 %v300_v46, %v299_v2 }
  0xbd   :  { %1285 = vmatprep.subr.bf16.mxu1 %v1933_v10  ;;  %v2084_v10 = vpack.c.bf16 %v298_v56, %v297_v20  ;;  %v593_v20 = vrot.slane %v2094_v45, %v1898_v19 }
  0xbe   :  { %2413 = vst [vmem:[#allocation48_spill] sm:$0xff] %v2088_v1 }
  0xbf   :  { %2412 = vst [vmem:[#allocation47_spill] sm:$0xff] %v2084_v10  ;;  %1446 = vmatpush3.bf16.msra.mxu0 %v2084_v10  ;;  %v601_v56 = vcombine.high %v593_v20, %v593_v20  ;;  %v628_v46 = vpack.c.bf16 %v593_v20, %v593_v20  ;;  %v618_v20 = vcombine.high %v610_v63, %v610_v63 }
  0xc0   :  { %1447 = vmatprep.subr.bf16.mxu0 %v2375_v47 }
  0xc1   :  { %v629_v2 = vpack.c.bf16 %v601_v56, %v601_v56  ;;  %v633_v56 = vpack.c.bf16 %v618_v20, %v618_v20  ;;  %v2143_v20 = vld [vmem:[%s2334_s4] ss:$0 sm:$0xff] }
  0xc3   :  { %1448 = vmatpush3.bf16.msra.mxu0 %v2088_v1  ;;  %668 = vmatprep.mubr.bf16.mxu1 %v629_v2  ;;  %v632_v2 = vpack.c.bf16 %v610_v63, %v610_v63 }
  0xc4   :  { %1449 = vmatprep.subr.bf16.mxu0 %v2375_v47  ;;  %669 = vmatmul.mubr.bf16.vlgmr.msra.gmra.mrb[8].mxu1 %v628_v46 }
  0xc5   :  { %1286 = vmatpush3.bf16.msra.mxu1 %v1939_v36  ;;  %748 = vmatprep.mubr.bf16.mxu1 %v633_v56 }
  0xc6   :  { %1287 = vmatprep.subr.bf16.mxu1 %v1945_v41 }
  0xc7   :  { %1450 = vmatpush3.bf16.msra.mxu0 %v2092_v49 }
  0xc8   :  { %1263 = vmatprep.subr.bf16.mxu0 %v1838_v7 }
  0xc9   :  { %1288 = vmatpush3.bf16.msra.mxu1 %v1951_v58 }
  0xca   :  { %1289 = vmatprep.subr.bf16.mxu1 %v1957_v61 }
  0xcd   :  { %1290 = vmatpush3.bf16.msra.mxu1 %v1963_v24 }
  0xce   :  { %1291 = vmatprep.subr.bf16.mxu1 %v1969_v31 }
  0xd1   :  { %1292 = vmatpush3.bf16.msra.mxu1 %v1975_v62 }
  0xd2   :  { %1293 = vmatprep.subr.bf16.mxu1 %v1984_v14 }
  0xd5   :  { %1294 = vmatpush3.bf16.msra.mxu1 %v1995_v50 }
  0xd6   :  { %1295 = vmatprep.subr.bf16.mxu1 %v2003_v44 }
  0xd9   :  { %1296 = vmatpush3.bf16.msra.mxu1 %v2009_v22 }
  0xda   :  { %1297 = vmatprep.subr.bf16.mxu1 %v2015_v32 }
  0xdd   :  { %1298 = vmatpush3.bf16.msra.mxu1 %v2021_v52 }
  0xde   :  { %1299 = vmatprep.subr.bf16.mxu1 %v2027_v15 }
  0xe1   :  { %1300 = vmatpush3.bf16.msra.mxu1 %v2033_v35 }
  0xe2   :  { %1455 = vmatprep.subr.bf16.mxu1 %v2375_v47 }
  0xe4   :  { %749 = vmatmul.mubr.bf16.vlgmr.msra.gmra.mrb[12].mxu1 %v632_v2 }
  0xe5   :  { %1456 = vmatpush3.bf16.msra.mxu1 %v2064_v40  ;;  %1471 = vmatprep.mubr.msk.bf16.mxu1 %vm1709_vm0, %v2375_v47 }
  0xe6   :  { %1457 = vmatprep.subr.bf16.mxu1 %v2375_v47 }
  0xe9   :  { %1458 = vmatpush3.bf16.msra.mxu1 %v2067_v9 }
  0xea   :  { %1459 = vmatprep.subr.bf16.mxu1 %v2375_v47 }
  0xed   :  { %1460 = vmatpush3.bf16.msra.mxu1 %v2071_v57 }
  0xee   :  { %1461 = vmatprep.subr.bf16.mxu1 %v2375_v47 }
  0xf1   :  { %1462 = vmatpush3.bf16.msra.mxu1 %v2075_v18 }
  0xf2   :  { %1463 = vmatprep.subr.bf16.mxu1 %v2375_v47 }
  0xf5   :  { %1464 = vmatpush3.bf16.msra.mxu1 %v2079_v0 }
  0xf6   :  { %1465 = vmatprep.subr.bf16.mxu1 %v2375_v47 }
  0xf9   :  { %1466 = vmatpush3.bf16.msra.mxu1 %v2084_v10 }
  0xfa   :  { %1467 = vmatprep.subr.bf16.mxu1 %v2375_v47 }
  0xfd   :  { %1468 = vmatpush3.bf16.msra.mxu1 %v2088_v1 }
  0xfe   :  { %1469 = vmatprep.subr.bf16.mxu1 %v2375_v47 }
 0x101   :  { %1470 = vmatpush3.bf16.msra.mxu1 %v2092_v49 }
 0x102   :  { %1360 = vmatprep.subr.bf16.mxu1 %v1838_v7  ;;  %v586_v7 = vcombine.high %v2094_v45, %v2094_v45  ;;  %v603_v45 = vcombine.high %v2114_v29, %v2114_v29  ;;  %v2418_v29 = vld [vmem:[#allocation27_spill] sm:$0xff] }
 0x104   :  { %v600_v52 = vrot.slane %v586_v7, %v1898_v19  ;;  %v2417_v7 = vld [vmem:[#allocation26_spill] sm:$0xff] }
 0x151   :  { %v1160_v46 = vpop.f32.mrb[0].mxu0 }
 0x152   :  { %v1182_v63 = vpop.f32.mrb[0].mxu1  ;;  %v1161_v56 = vpop.f32.mrb[1].mxu0 }
 0x153   :  { %v1162_v2 = vadd.f32 %v1161_v56, %v1160_v46  ;;  %v1183_v10 = vpop.f32.mrb[1].mxu1  ;;  %v1163_v0 = vpop.f32.mrb[2].mxu0 }
 0x154   :  { %v1184_v18 = vadd.f32 %v1183_v10, %v1182_v63  ;;  %v1185_v57 = vpop.f32.mrb[2].mxu1  ;;  %v1164_v1 = vpop.f32.mrb[3].mxu0  ;;  %v602_v63 = vcombine.high %v600_v52, %v600_v52 }
 0x155   :  { %v407_v47 = vadd.f32 %v1162_v2, %v2143_v20  ;;  %v1186_v9 = vpop.f32.mrb[3].mxu1 }
 0x157   :  { %v447_v49 = vadd.f32 %v1184_v18, %v407_v47  ;;  %v631_v47 = vpack.c.bf16 %v602_v63, %v602_v63  ;;  %v2426_v63 = vld [vmem:[#allocation35_spill] sm:$0xff] }
 0x171   :  { %v1204_v40 = vpop.f32.mrb[4].mxu0 }
 0x172   :  { %v1226_v35 = vpop.f32.mrb[4].mxu1  ;;  %v1205_v15 = vpop.f32.mrb[5].mxu0 }
 0x173   :  { %v1206_v32 = vadd.f32 %v1205_v15, %v1204_v40  ;;  %v1227_v22 = vpop.f32.mrb[5].mxu1  ;;  %v1207_v46 = vpop.f32.mrb[6].mxu0  ;;  %v630_v15 = vpack.c.bf16 %v600_v52, %v600_v52  ;;  %v2424_v52 = vld [vmem:[#allocation33_spill] sm:$0xff] }
 0x174   :  { %v1228_v56 = vadd.f32 %v1227_v22, %v1226_v35  ;;  %v1229_v0 = vpop.f32.mrb[6].mxu1  ;;  %v1208_v10 = vpop.f32.mrb[7].mxu0  ;;  %v2416_v35 = vld [vmem:[#allocation24_spill] sm:$0xff] }
 0x175   :  { %v487_v57 = vadd.f32 %v1206_v32, %v447_v49  ;;  %v1230_v1 = vpop.f32.mrb[7].mxu1  ;;  %v617_v49 = vrot.slane %v603_v45, %v1898_v19  ;;  %v2415_v32 = vld [vmem:[#allocation22_spill] sm:$0xff]  ;;  %v2419_v46 = vld [vmem:[#allocation28_spill] sm:$0xff]  ;;  %v2422_v10 = vld [vmem:[#allocation31_spill] sm:$0xff] }
 0x176   :  { %v2421_v0 = vld [vmem:[#allocation30_spill] sm:$0xff] }
 0x177   :  { %v527_v2 = vadd.f32 %v1228_v56, %v487_v57  ;;  %v619_v22 = vcombine.high %v617_v49, %v617_v49  ;;  %v2420_v56 = vld [vmem:[#allocation29_spill] sm:$0xff]  ;;  %v2423_v57 = vld [vmem:[#allocation32_spill] sm:$0xff]  ;;  %v2425_v1 = vld [vmem:[#allocation34_spill] sm:$0xff] }
 0x179   :  { %v532_v9 = vmax.f32 %v527_v2, 0.0  ;;  %v635_v40 = vpack.c.bf16 %v619_v22, %v619_v22  ;;  %v2427_v2 = vld [vmem:[#allocation36_spill] sm:$0xff] }
 0x17b   :  { %v533_v18 = vpack.c.bf16 %v532_v9, %v532_v9  ;;  %v634_v9 = vpack.c.bf16 %v617_v49, %v617_v49 }
 0x17d   :  { %1452 = vmatmul.mubr.bf16.vlgmr.msra.gmra.mrb[8].mxu0 %v533_v18  ;;  %v2204_v18 = vld [vmem:[#allocation7] sm:$0xff] }
 0x17e   :  { %1264 = vmatpush3.bf16.msra.mxu0 %v1843_v12  ;;  %708 = vmatprep.mubr.bf16.mxu0 %v631_v47  ;;  %v851_v45 = vrot.slane %v2204_v18, %v1898_v19 }
 0x17f   :  { %1265 = vmatprep.subr.bf16.mxu0 %v1849_v17 }
 0x180   :  { %v859_v49 = vcombine.high %v851_v45, %v851_v45 }
 0x182   :  { %1266 = vmatpush3.bf16.msra.mxu0 %v1856_v25  ;;  %v887_v22 = vpack.c.bf16 %v859_v49, %v859_v49  ;;  %v2445_v49 = vld [vmem:[#allocation49_spill] sm:$0xff] }
 0x183   :  { %1267 = vmatprep.subr.bf16.mxu0 %v1860_v30 }
 0x186   :  { %1268 = vmatpush3.bf16.msra.mxu0 %v1867_v38 }
 0x187   :  { %1269 = vmatprep.subr.bf16.mxu0 %v1872_v43 }
 0x18a   :  { %1270 = vmatpush3.bf16.msra.mxu0 %v1879_v54 }
 0x18b   :  { %1271 = vmatprep.subr.bf16.mxu0 %v1884_v59 }
 0x18e   :  { %1272 = vmatpush3.bf16.msra.mxu0 %v1891_v5 }
 0x18f   :  { %1273 = vmatprep.subr.bf16.mxu0 %v1896_v13 }
 0x192   :  { %1274 = vmatpush3.bf16.msra.mxu0 %v1905_v27 }
 0x193   :  { %1275 = vmatprep.subr.bf16.mxu0 %v1910_v33 }
 0x196   :  { %1276 = vmatpush3.bf16.msra.mxu0 %v1919_v48 }
 0x197   :  { %1277 = vmatprep.subr.bf16.mxu0 %v2415_v32 }
 0x19a   :  { %1278 = vmatpush3.bf16.msra.mxu0 %v2416_v35 }
 0x19b   :  { %1307 = vmatprep.subr.bf16.mxu0 %v2417_v7 }
 0x19d   :  { %709 = vmatmul.mubr.bf16.vlgmr.msra.gmra.mrb[12].mxu0 %v630_v15  ;;  %v886_v15 = vpack.c.bf16 %v851_v45, %v851_v45  ;;  %v2444_v45 = vld [vmem:[#allocation48_spill] sm:$0xff] }
 0x19e   :  { %1308 = vmatpush3.bf16.msra.mxu0 %v2418_v29  ;;  %788 = vmatprep.mubr.bf16.mxu0 %v635_v40  ;;  %v2432_v40 = vld [vmem:[#allocation37_spill] sm:$0xff] }
 0x19f   :  { %1309 = vmatprep.subr.bf16.mxu0 %v2419_v46 }
 0x1a2   :  { %1310 = vmatpush3.bf16.msra.mxu0 %v2420_v56 }
 0x1a3   :  { %1311 = vmatprep.subr.bf16.mxu0 %v2421_v0 }
 0x1a6   :  { %1312 = vmatpush3.bf16.msra.mxu0 %v2422_v10 }
 0x1a7   :  { %1313 = vmatprep.subr.bf16.mxu0 %v2423_v57 }
 0x1aa   :  { %1314 = vmatpush3.bf16.msra.mxu0 %v2424_v52 }
 0x1ab   :  { %1315 = vmatprep.subr.bf16.mxu0 %v2425_v1 }
 0x1ae   :  { %1316 = vmatpush3.bf16.msra.mxu0 %v2426_v63 }
 0x1af   :  { %1317 = vmatprep.subr.bf16.mxu0 %v2427_v2 }
 0x1b2   :  { %1318 = vmatpush3.bf16.msra.mxu0 %v2013_v60 }
 0x1b3   :  { %1319 = vmatprep.subr.bf16.mxu0 %v2018_v51 }
 0x1b6   :  { %1320 = vmatpush3.bf16.msra.mxu0 %v2025_v37 }
 0x1b7   :  { %1321 = vmatprep.subr.bf16.mxu0 %v2030_v11 }
 0x1ba   :  { %1322 = vmatpush3.bf16.msra.mxu0 %v2037_v42 }
 0x1bb   :  { %1338 = vmatprep.subr.bf16.mxu0 %v1836_v3  ;;  %v1257_v3 = vpop.f32.mrb[8].mxu1 }
 0x1bd   :  { %789 = vmatmul.mubr.bf16.vlgmr.msra.gmra.mrb[16].mxu0 %v634_v9  ;;  %v2438_v9 = vld [vmem:[#allocation42_spill] sm:$0xff] }
 0x1be   :  { %1339 = vmatpush3.bf16.msra.mxu0 %v1840_v8  ;;  %v1258_v8 = vpop.f32.mrb[9].mxu1  ;;  %926 = vmatprep.mubr.bf16.mxu0 %v887_v22 }
 0x1bf   :  { %1340 = vmatprep.subr.bf16.mxu0 %v1847_v16  ;;  %v2428_v16 = vld [vmem:[#allocation20_spill] sm:$0xff] }
 0x1c2   :  { %1341 = vmatpush3.bf16.msra.mxu0 %v1852_v21  ;;  %v2197_v21 = vadd.f32 %v1258_v8, %v1257_v3  ;;  %v2439_v3 = vld [vmem:[#allocation43_spill] sm:$0xff]  ;;  %v2440_v8 = vld [vmem:[#allocation44_spill] sm:$0xff] }
 0x1c3   :  { %1342 = vmatprep.subr.bf16.mxu0 %v1858_v26  ;;  %v1260_v26 = vpop.f32.mrb[10].mxu1 }
 0x1c4   :  { %v2241_v26 = vld [vmem:[%s2336_s6] ss:$0 sm:$0xff]  ;;  %v671_v22 = vadd.f32 %v2197_v21, %v2143_v20  ;;  %s1710_s6 = smov [#allocation12]  }
 0x1c5   :  { %s1114_s25 = sshll.u32 %s1710_s6, 4  ;;  %s1115_s25 = int_to_ptr.vmem [resolvable:$true] %s1114_s25 }
 0x1c6   :  { %1343 = vmatpush3.bf16.msra.mxu0 %v1863_v34  ;;  %v2429_v34 = vld [vmem:[#allocation21_spill] sm:$0xff]  ;;  %s1624_s28 = scalar_lea.vmem %s1115_s25, 16  ;;  %s1628_s29 = scalar_lea.vmem %s1115_s25, 32 }
 0x1c7   :  { %1344 = vmatprep.subr.bf16.mxu0 %v1869_v39  ;;  %v1261_v39 = vpop.f32.mrb[11].mxu1  ;;  %p1625_p12 = scmp.ne.s32.totalorder %s1115_s25, %s1624_s28  ;;  %p1629_p13 = scmp.lt.s32.totalorder %s1115_s25, %s1115_s25 }
 0x1c8   :  { %p1630_p0 = scmp.lt.s32.totalorder %s1628_s29, %s1624_s28 }
 0x1ca   :  { %1345 = vmatpush3.bf16.msra.mxu0 %v1875_v53  ;;  %v2430_v53 = vld [vmem:[#allocation23_spill] sm:$0xff]  ;;  %p1631_p1 = por %p1630_p0, %p1629_p13 }
 0x1cb   :  { %1346 = vmatprep.subr.bf16.mxu0 %v1881_v55  ;;  %v2431_v55 = vld [vmem:[#allocation25_spill] sm:$0xff] }
 0x1cc   :  { %p1632_p2 = pnand %p1631_p1, %p1625_p12 }
 0x1ce   :  { %1347 = vmatpush3.bf16.msra.mxu0 %v1887_v4  ;;  %v1301_v4 = vpop.f32.mrb[12].mxu1 }
 0x1cf   :  { %1348 = vmatprep.subr.bf16.mxu0 %v1893_v6  ;;  %v1302_v6 = vpop.f32.mrb[13].mxu1 }
 0x1d0   :  { %v2202_v47 = vadd.f32 %v1302_v6, %v1301_v4  ;;  %v2443_v6 = vld [vmem:[#allocation47_spill] sm:$0xff] }
 0x1d2   :  { %1349 = vmatpush3.bf16.msra.mxu0 %v1901_v23  ;;  %v1304_v23 = vpop.f32.mrb[14].mxu1 }
 0x1d3   :  { %1350 = vmatprep.subr.bf16.mxu0 %v1907_v28  ;;  %v1305_v28 = vpop.f32.mrb[15].mxu1 }
 0x1d6   :  { %1351 = vmatpush3.bf16.msra.mxu0 %v2428_v16  ;;  %v2441_v16 = vld [vmem:[#allocation45_spill] sm:$0xff] }
 0x1d7   :  { %1352 = vmatprep.subr.bf16.mxu0 %v2429_v34  ;;  %v2442_v34 = vld [vmem:[#allocation46_spill] sm:$0xff] }
 0x1da   :  { %1353 = vmatpush3.bf16.msra.mxu0 %v2430_v53 }
 0x1db   :  { %1382 = vmatprep.subr.bf16.mxu0 %v2431_v55 }
 0x1dd   :  { %927 = vmatmul.mubr.bf16.vlgmr.msra.gmra.mrb[20].mxu0 %v886_v15 }
 0x1de   :  { %1383 = vmatpush3.bf16.msra.mxu0 %v1939_v36  ;;  %v2433_v36 = vld [vmem:[#allocation38_spill] sm:$0xff] }
 0x1df   :  { %1384 = vmatprep.subr.bf16.mxu0 %v1945_v41  ;;  %v2220_v41 = vld [vmem:[#allocation7 + $0x8] sm:$0xff] }
 0x1e2   :  { %1385 = vmatpush3.bf16.msra.mxu0 %v1951_v58  ;;  %v868_v58 = vrot.slane %v2220_v41, %v1898_v19 }
 0x1e3   :  { %1386 = vmatprep.subr.bf16.mxu0 %v1957_v61  ;;  %v2434_v61 = vld [vmem:[#allocation39_spill] sm:$0xff] }
 0x1e6   :  { %1387 = vmatpush3.bf16.msra.mxu0 %v1963_v24  ;;  %v2435_v24 = vld [vmem:[#allocation40_spill] sm:$0xff] }
 0x1e7   :  { %1388 = vmatprep.subr.bf16.mxu0 %v1969_v31  ;;  %v876_v31 = vcombine.high %v868_v58, %v868_v58 }
 0x1ea   :  { %1389 = vmatpush3.bf16.msra.mxu0 %v1975_v62  ;;  %v891_v62 = vpack.c.bf16 %v876_v31, %v876_v31 }
 0x1eb   :  { %1390 = vmatprep.subr.bf16.mxu0 %v1984_v14  ;;  %v2436_v14 = vld [vmem:[#allocation41_spill] sm:$0xff] }
 0x1ec   :  { %1006 = vmatprep.mubr.bf16.mxu0 %v891_v62  ;;  %v844_v62 = vcombine.high %v2204_v18, %v2204_v18 }
 0x1ee   :  { %1391 = vmatpush3.bf16.msra.mxu0 %v1995_v50  ;;  %v890_v50 = vpack.c.bf16 %v868_v58, %v868_v58 }
 0x1ef   :  { %1392 = vmatprep.subr.bf16.mxu0 %v2003_v44  ;;  %v2437_v44 = vmov 0.0  }
 0x1f2   :  { %1393 = vmatpush3.bf16.msra.mxu0 %v2432_v40 }
 0x1f3   :  { %1394 = vmatprep.subr.bf16.mxu0 %v2433_v36 }
 0x1f6   :  { %1395 = vmatpush3.bf16.msra.mxu0 %v2434_v61 }
 0x1f7   :  { %1396 = vmatprep.subr.bf16.mxu0 %v2435_v24 }
 0x1fa   :  { %1397 = vmatpush3.bf16.msra.mxu0 %v2436_v14  ;;  %v858_v14 = vrot.slane %v844_v62, %v1898_v19 }
 0x1fb   :  { %1475 = vmatprep.subr.bf16.mxu0 %v2437_v44 }
 0x1fd   :  { %1007 = vmatmul.mubr.bf16.vlgmr.msra.gmra.mrb[24].mxu0 %v890_v50 }
 0x1fe   :  { %1476 = vmatpush3.bf16.msra.mxu0 %v2438_v9  ;;  %1491 = vmatprep.mubr.msk.bf16.mxu0 %vm1709_vm0, %v2437_v44 }
 0x1ff   :  { %1477 = vmatprep.subr.bf16.mxu0 %v2437_v44 }
 0x202   :  { %1478 = vmatpush3.bf16.msra.mxu0 %v2439_v3 }
 0x203   :  { %1479 = vmatprep.subr.bf16.mxu0 %v2437_v44 }
 0x206   :  { %1480 = vmatpush3.bf16.msra.mxu0 %v2440_v8 }
 0x207   :  { %1481 = vmatprep.subr.bf16.mxu0 %v2437_v44 }
 0x20a   :  { %1482 = vmatpush3.bf16.msra.mxu0 %v2441_v16  ;;  %v860_v16 = vcombine.high %v858_v14, %v858_v14 }
 0x20b   :  { %1483 = vmatprep.subr.bf16.mxu0 %v2437_v44 }
 0x20e   :  { %1484 = vmatpush3.bf16.msra.mxu0 %v2442_v34 }
 0x20f   :  { %1485 = vmatprep.subr.bf16.mxu0 %v2437_v44 }
 0x212   :  { %1486 = vmatpush3.bf16.msra.mxu0 %v2443_v6 }
 0x213   :  { %1487 = vmatprep.subr.bf16.mxu0 %v2437_v44 }
 0x216   :  { %1488 = vmatpush3.bf16.msra.mxu0 %v2444_v45 }
 0x217   :  { %1489 = vmatprep.subr.bf16.mxu0 %v2437_v44 }
 0x21a   :  { %1490 = vmatpush3.bf16.msra.mxu0 %v2445_v49 }
 0x250   :  { %v574_v39 = vpop.f32.mrb[8].mxu0 }
 0x251   :  { %v575_v53 = vadd.f32 %v2241_v26, %v574_v39  ;;  %v1453_v55 = vpop.f32.mrb[9].mxu0  ;;  %v889_v39 = vpack.c.bf16 %v860_v16, %v860_v16 }
 0x252   :  { %v577_v4 = vpop.f32.mrb[10].mxu0 }
 0x253   :  { %v580_v23 = vpack.c.bf16 %v575_v53, %v575_v53  ;;  %v1454_v28 = vpop.f32.mrb[11].mxu0 }
 0x255   :  { %581 = vst [vmem:[#allocation11] sm:$0x1] %v580_v23 }
 0x270   :  { %v1279_v15 = vpop.f32.mrb[12].mxu0 }
 0x271   :  { %v1280_v40 = vpop.f32.mrb[13].mxu0 }
 0x272   :  { %v1281_v36 = vadd.f32 %v1280_v40, %v1279_v15  ;;  %v1282_v58 = vpop.f32.mrb[14].mxu0 }
 0x273   :  { %v1283_v61 = vpop.f32.mrb[15].mxu0 }
 0x274   :  { %v711_v24 = vadd.f32 %v1281_v36, %v671_v22 }
 0x276   :  { %v751_v31 = vadd.f32 %v2202_v47, %v711_v24 }
 0x290   :  { %v1323_v50 = vpop.f32.mrb[16].mxu0 }
 0x291   :  { %v1324_v44 = vpop.f32.mrb[17].mxu0 }
 0x292   :  { %v1325_v9 = vadd.f32 %v1324_v44, %v1323_v50  ;;  %v1326_v3 = vpop.f32.mrb[18].mxu0 }
 0x293   :  { %v1327_v8 = vpop.f32.mrb[19].mxu0 }
 0x294   :  { %v791_v21 = vadd.f32 %v1325_v9, %v751_v31 }
 0x296   :  { %v796_v34 = vmax.f32 %v791_v21, 0.0 }
 0x298   :  { %v797_v53 = vpack.c.bf16 %v796_v34, %v796_v34 }
 0x29a   :  { %1472 = vmatmul.mubr.bf16.vlgmr.msra.gmra.mrb[16].mxu1 %v797_v53 }
 0x29b   :  { %1361 = vmatpush3.bf16.msra.mxu1 %v1843_v12  ;;  %966 = vmatprep.mubr.bf16.mxu1 %v889_v39  ;;  %v861_v12 = vcombine.high %v2220_v41, %v2220_v41 }
 0x29c   :  { %1362 = vmatprep.subr.bf16.mxu1 %v1849_v17 }
 0x29d   :  { %v875_v17 = vrot.slane %v861_v12, %v1898_v19 }
 0x29f   :  { %1363 = vmatpush3.bf16.msra.mxu1 %v1856_v25  ;;  %v877_v25 = vcombine.high %v875_v17, %v875_v17 }
 0x2a0   :  { %1364 = vmatprep.subr.bf16.mxu1 %v1860_v30  ;;  %v888_v30 = vpack.c.bf16 %v858_v14, %v858_v14 }
 0x2a3   :  { %1365 = vmatpush3.bf16.msra.mxu1 %v1867_v38  ;;  %v893_v38 = vpack.c.bf16 %v877_v25, %v877_v25 }
 0x2a4   :  { %1366 = vmatprep.subr.bf16.mxu1 %v1872_v43  ;;  %v892_v43 = vpack.c.bf16 %v875_v17, %v875_v17 }
 0x2a7   :  { %1367 = vmatpush3.bf16.msra.mxu1 %v1879_v54 }
 0x2a8   :  { %1368 = vmatprep.subr.bf16.mxu1 %v1884_v59 }
 0x2ab   :  { %1369 = vmatpush3.bf16.msra.mxu1 %v1891_v5 }
 0x2ac   :  { %1370 = vmatprep.subr.bf16.mxu1 %v1896_v13 }
 0x2af   :  { %1371 = vmatpush3.bf16.msra.mxu1 %v1905_v27 }
 0x2b0   :  { %1372 = vmatprep.subr.bf16.mxu1 %v1910_v33  ;;  %v1354_v54 = vpop.f32.mrb[20].mxu0 }
 0x2b1   :  { %v1355_v59 = vpop.f32.mrb[21].mxu0 }
 0x2b2   :  { %v1356_v5 = vadd.f32 %v1355_v59, %v1354_v54  ;;  %v1357_v13 = vpop.f32.mrb[22].mxu0 }
 0x2b3   :  { %1373 = vmatpush3.bf16.msra.mxu1 %v1919_v48  ;;  %v1358_v19 = vpop.f32.mrb[23].mxu0 }
 0x2b4   :  { %1374 = vmatprep.subr.bf16.mxu1 %v2415_v32 }
 0x2b7   :  { %1375 = vmatpush3.bf16.msra.mxu1 %v2416_v35 }
 0x2b8   :  { %1404 = vmatprep.subr.bf16.mxu1 %v2417_v7 }
 0x2ba   :  { %967 = vmatmul.mubr.bf16.vlgmr.msra.gmra.mrb[20].mxu1 %v888_v30 }
 0x2bb   :  { %1405 = vmatpush3.bf16.msra.mxu1 %v2418_v29  ;;  %1046 = vmatprep.mubr.bf16.mxu1 %v893_v38 }
 0x2bc   :  { %1406 = vmatprep.subr.bf16.mxu1 %v2419_v46 }
 0x2bf   :  { %1407 = vmatpush3.bf16.msra.mxu1 %v2420_v56 }
 0x2c0   :  { %1408 = vmatprep.subr.bf16.mxu1 %v2421_v0 }
 0x2c3   :  { %1409 = vmatpush3.bf16.msra.mxu1 %v2422_v10 }
 0x2c4   :  { %1410 = vmatprep.subr.bf16.mxu1 %v2423_v57 }
 0x2c7   :  { %1411 = vmatpush3.bf16.msra.mxu1 %v2424_v52 }
 0x2c8   :  { %1412 = vmatprep.subr.bf16.mxu1 %v2425_v1 }
 0x2cb   :  { %1413 = vmatpush3.bf16.msra.mxu1 %v2426_v63 }
 0x2cc   :  { %1414 = vmatprep.subr.bf16.mxu1 %v2427_v2 }
 0x2cf   :  { %1415 = vmatpush3.bf16.msra.mxu1 %v2013_v60 }
 0x2d0   :  { %1416 = vmatprep.subr.bf16.mxu1 %v2018_v51  ;;  %v1398_v27 = vpop.f32.mrb[24].mxu0 }
 0x2d1   :  { %v1399_v33 = vpop.f32.mrb[25].mxu0 }
 0x2d2   :  { %v1400_v48 = vadd.f32 %v1399_v33, %v1398_v27  ;;  %v1401_v32 = vpop.f32.mrb[26].mxu0 }
 0x2d3   :  { %1417 = vmatpush3.bf16.msra.mxu1 %v2025_v37  ;;  %v1402_v60 = vpop.f32.mrb[27].mxu0 }
 0x2d4   :  { %1418 = vmatprep.subr.bf16.mxu1 %v2030_v11 }
 0x2d7   :  { %1419 = vmatpush3.bf16.msra.mxu1 %v2037_v42  ;;  %v929_v42 = vadd.f32 %v1356_v5, %v2143_v20 }
 0x2da   :  { %1047 = vmatmul.mubr.bf16.vlgmr.msra.gmra.mrb[24].mxu1 %v892_v43 }
 0x36d   :  { %v832_v35 = vpop.f32.mrb[16].mxu1 }
 0x36e   :  { %v833_v51 = vadd.f32 %v2241_v26, %v832_v35  ;;  %v1473_v37 = vpop.f32.mrb[17].mxu1 }
 0x36f   :  { %v835_v7 = vpop.f32.mrb[18].mxu1 }
 0x370   :  { %v838_v11 = vpack.c.bf16 %v833_v51, %v833_v51  ;;  %v1474_v29 = vpop.f32.mrb[19].mxu1 }
 0x372   :  { %839 = vst [vmem:[#allocation12] sm:$0x1] %v838_v11 }
 0x38d   :  { %v1376_v46 = vpop.f32.mrb[20].mxu1 }
 0x38e   :  { %v1377_v56 = vpop.f32.mrb[21].mxu1 }
 0x38f   :  { %v1378_v0 = vadd.f32 %v1377_v56, %v1376_v46  ;;  %v1379_v10 = vpop.f32.mrb[22].mxu1 }
 0x390   :  { %v1380_v57 = vpop.f32.mrb[23].mxu1 }
 0x391   :  { %v969_v52 = vadd.f32 %v1378_v0, %v929_v42 }
 0x393   :  { %v1009_v1 = vadd.f32 %v1400_v48, %v969_v52 }
 0x3ad   :  { %v1420_v63 = vpop.f32.mrb[24].mxu1 }
 0x3ae   :  { %v1421_v2 = vpop.f32.mrb[25].mxu1 }
 0x3af   :  { %v1422_v47 = vadd.f32 %v1421_v2, %v1420_v63  ;;  %v1423_v18 = vpop.f32.mrb[26].mxu1 }
 0x3b0   :  { %v1424_v41 = vpop.f32.mrb[27].mxu1 }
 0x3b1   :  { %v1049_v55 = vadd.f32 %v1422_v47, %v1009_v1 }
 0x3b3   :  { %v1054_v4 = vmax.f32 %v1049_v55, 0.0 }
 0x3b5   :  { %v1055_v6 = vpack.c.bf16 %v1054_v4, %v1054_v4 }
 0x3b7   :  { %1492 = vmatmul.mubr.bf16.vlgmr.msra.gmra.mrb[28].mxu0 %v1055_v6 }
 0x3b8   :  { %1635 = shalt.err (!%p1632_p2)
}
 0x3b9   :  { %s1636_s13 = scalar_lea.hbm %s2338_s8, 16 }
 0x3ba   :  { %p1637_p3 = scmp.ne.s32.totalorder %s2338_s8, %s1636_s13  ;;  %p1640_p4 = scmp.lt.u32.totalorder %s1636_s13, %s2338_s8 }
 0x3bc   :  { %p1642_p5 = pnand %p1640_p4, %p1637_p3 }
 0x3be   :  { %1645 = shalt.err (!%p1642_p5)
}
 0x3bf   :  { %1117 = dma.vmem_to_hbm [thread:$0]  %s1115_s25, 16, %s2338_s8, [#allocation13]  }
 0x3c0   :  { %s1646_s20 = scalar_lea.vmem %s1105_s27, 16  ;;  %s1650_s21 = scalar_lea.vmem %s1105_s27, 32 }
 0x3c1   :  { %p1647_p6 = scmp.ne.s32.totalorder %s1105_s27, %s1646_s20  ;;  %p1651_p7 = scmp.lt.s32.totalorder %s1105_s27, %s1105_s27 }
 0x3c2   :  { %p1652_p8 = scmp.lt.s32.totalorder %s1650_s21, %s1646_s20 }
 0x3c4   :  { %p1653_p9 = por %p1652_p8, %p1651_p7 }
 0x3c6   :  { %p1654_p10 = pnand %p1653_p9, %p1647_p6 }
 0x3c8   :  { %1657 = shalt.err (!%p1654_p10)
}
 0x3c9   :  { %s1658_s24 = scalar_lea.hbm %s2337_s7, 16 }
 0x3ca   :  { %p1659_p11 = scmp.ne.s32.totalorder %s2337_s7, %s1658_s24  ;;  %p1662_p12 = scmp.lt.u32.totalorder %s1658_s24, %s2337_s7 }
 0x3cc   :  { %p1664_p13 = pnand %p1662_p12, %p1659_p11 }
 0x3ce   :  { %1667 = shalt.err (!%p1664_p13)
}
 0x3cf   :  { %1107 = dma.vmem_to_hbm [thread:$0]  %s1105_s27, 16, %s2337_s7, [#allocation4]  }
 0x3d0   :  { %s1712_s1 = smov [#allocation14]  }
 0x3d1   :  { %s1124_s4 = sshll.u32 %s1712_s1, 4  ;;  %s1125_s4 = int_to_ptr.vmem [resolvable:$true] %s1124_s4 }
 0x3d2   :  { %s1668_s10 = scalar_lea.vmem %s1125_s4, 16  ;;  %s1672_s6 = scalar_lea.vmem %s1125_s4, 32 }
 0x3d3   :  { %p1669_p0 = scmp.ne.s32.totalorder %s1125_s4, %s1668_s10  ;;  %p1673_p1 = scmp.lt.s32.totalorder %s1125_s4, %s1125_s4 }
 0x3d4   :  { %p1674_p2 = scmp.lt.s32.totalorder %s1672_s6, %s1668_s10 }
 0x3d6   :  { %p1675_p3 = por %p1674_p2, %p1673_p1 }
 0x3d8   :  { %p1676_p4 = pnand %p1675_p3, %p1669_p0 }
 0x48a   :  { %v1090_v20 = vpop.f32.mrb[28].mxu0 }
 0x48b   :  { %v1091_v23 = vadd.f32 %v2241_v26, %v1090_v20  ;;  %v1493_v28 = vpop.f32.mrb[29].mxu0 }
 0x48c   :  { %v1093_v45 = vpop.f32.mrb[30].mxu0 }
 0x48d   :  { %v1096_v49 = vpack.c.bf16 %v1091_v23, %v1091_v23  ;;  %v1494_v22 = vpop.f32.mrb[31].mxu0 }
 0x48f   :  { %1097 = vst [vmem:[#allocation14] sm:$0x1] %v1096_v49 }
 0x490   :  { %1679 = shalt.err (!%p1676_p4)
}
 0x491   :  { %s1680_s26 = scalar_lea.hbm %s2339_s9, 16 }
 0x492   :  { %p1681_p5 = scmp.ne.s32.totalorder %s2339_s9, %s1680_s26  ;;  %p1684_p6 = scmp.lt.u32.totalorder %s1680_s26, %s2339_s9 }
 0x494   :  { %p1686_p7 = pnand %p1684_p6, %p1681_p5 }
 0x496   :  { %1689 = shalt.err (!%p1686_p7)
}
 0x497   :  { %1127 = dma.vmem_to_hbm [thread:$0]  %s1125_s4, 16, %s2339_s9, [#allocation13]  }
 0x498   :  { %1696 = dma.done.wait [#allocation4], 16  }
 0x499   :  { %1697 = vsyncadd [#allocation4], 4294967280 }
 0x49a   :  { %1698 = dma.done.wait [#allocation13], 32  }
 0x49b   :  { %1699 = vsyncadd [#allocation13], 4294967264 }
 0x49c   :  { %1137 = vsyncpa [#allocation3], 1 }
 0x49d   :  { %1138 = vsyncpa [#allocation6], 1 }
 0x49e   :  { %1139 = vsyncpa [#allocation9], 1 }
 0x49f   :  { %1140 = vsyncpa [#allocation4], 1 }
 0x4a0   :  { %1141 = vsyncpa [#allocation13], 1 }

</bundles_post_ra>
